<compile_context>
chip_gen: v6e
topology: v6e:2x2x1
jax: 0.10.0
libtpu: 0.0.40
codegen_flags: <defaults>
</compile_context>

<pallas_src>
import functools

import jax
import jax.numpy as jnp
import numpy as np
from jax import lax
from jax.experimental import pallas as pl
from jax.experimental.pallas import tpu as pltpu

BN_EPS = 1e-5


def _device_kind() -> str:
    try:
        return jax.devices()[0].device_kind.lower()
    except Exception:
        return ""


_KIND = _device_kind()
_IS_V7X = ("v7" in _KIND) or ("7x" in _KIND)

# bf16 matmul inputs are MXU-native on every generation (v5e's MXU takes bf16
# too — only its VPU/EUP lack bf16, and all gate math / state stays f32).
MATMUL_DTYPE = jnp.bfloat16
XPROJ_DTYPE = MATMUL_DTYPE            # the (T*N, 4H) slab: written once, read once
_MM_BYTES = 2 if MATMUL_DTYPE == jnp.bfloat16 else 4
_XP_BYTES = 2 if XPROJ_DTYPE == jnp.bfloat16 else 4

# Explicit scoped-VMEM budget: v7x has 64 MiB / TensorCore (default scoped
# limit 32 MiB); v5e/v6e have 128 MiB.
VMEM_LIMIT_BYTES = (48 if _IS_V7X else 64) * 1024 * 1024


# --------------------------------------------------------------------------
# Kernel 1: BatchNorm batch statistics over the SequenceWise collapse (T*N, C).
# Shifted single-pass accumulation (anchor k = first row) so the variance does
# not suffer catastrophic cancellation when |mean| >> std.
# --------------------------------------------------------------------------
def bn_stats_kernel(x_ref, shift_ref, sum_ref, sq_ref, *, tile_rows, total_rows):
    r = pl.program_id(0)

    @pl.when(r == 0)
    def _():
        sum_ref[...] = jnp.zeros_like(sum_ref)
        sq_ref[...] = jnp.zeros_like(sq_ref)

    x = x_ref[...].astype(jnp.float32) - shift_ref[...]     # (tile_rows, C)
    if total_rows % tile_rows:                               # ragged last tile
        row = lax.broadcasted_iota(jnp.int32, x.shape, 0) + r * tile_rows
        x = jnp.where(row < total_rows, x, 0.0)
    sum_ref[...] += jnp.sum(x, axis=0, keepdims=True)
    sq_ref[...] += jnp.sum(x * x, axis=0, keepdims=True)


# --------------------------------------------------------------------------
# Kernel 2: hoisted input projection (BN scale/shift + bias folded into
# w_ref / b_ref by the wrapper):  out = x @ W_eff + b_eff, stored in bf16.
# --------------------------------------------------------------------------
def input_proj_kernel(x_ref, w_ref, b_ref, o_ref):
    x = x_ref[...].astype(w_ref.dtype)
    acc = jnp.dot(x, w_ref[...], preferred_element_type=jnp.float32)
    o_ref[...] = (acc + b_ref[...]).astype(o_ref.dtype)


# --------------------------------------------------------------------------
# Kernel 3: LSTM recurrence over a TILE_T block of timesteps.
# Per step: gates = xproj[t] + h @ W_hh (packed i,f,g,o, 4H lanes wide).
# h/c live in VMEM scratch across the "arbitrary" time axis.
# --------------------------------------------------------------------------
def lstm_tile_kernel(xp_ref, w_hh_ref, out_ref, h_scr, c_scr, *,
                     tile_t, hidden, unroll):
    t_idx = pl.program_id(1)

    @pl.when(t_idx == 0)
    def _():
        h_scr[...] = jnp.zeros_like(h_scr)
        c_scr[...] = jnp.zeros_like(c_scr)

    w_hh = w_hh_ref[...]                                     # (H, 4H), resident

    def step(tt, carry):
        h, c = carry
        gates = (xp_ref[tt].astype(jnp.float32)
                 + jnp.dot(h.astype(w_hh.dtype), w_hh,
                           preferred_element_type=jnp.float32))
        # i and f are adjacent in the packed layout: one sigmoid over the
        # contiguous 2H slice, one over o, one tanh over g.
        i_f = jax.nn.sigmoid(gates[:, :2 * hidden])
        i_g = i_f[:, :hidden]
        f_g = i_f[:, hidden:]
        g_g = jnp.tanh(gates[:, 2 * hidden:3 * hidden])
        o_g = jax.nn.sigmoid(gates[:, 3 * hidden:])
        c_new = f_g * c + i_g * g_g
        h_new = o_g * jnp.tanh(c_new)
        out_ref[tt] = h_new.astype(out_ref.dtype)
        return h_new, c_new

    h, c = lax.fori_loop(0, tile_t, step, (h_scr[...], c_scr[...]),
                         unroll=unroll)
    h_scr[...] = h
    c_scr[...] = c


# --------------------------------------------------------------------------
# Wrapper
# --------------------------------------------------------------------------
@jax.jit
def batch_rnn_forward(x, gamma, beta, w_ih, w_hh, b):
    """x: (T, N, C) f32.  Per-gate params (PyTorch i,f,g,o order):
       w_ih (4, C, H), w_hh (4, H, H), b (4, 1, H).  Returns (T, N, H) f32."""
    T, N, C = x.shape
    H = w_hh.shape[-1]
    G = 4 * H
    R = T * N

    # ---- pack gates so every matmul produces a lane-dense 4H-wide output.
    # TODO(synk): pad G up to a multiple of 128 (256 on v6e/v7x) when H is not
    # MXU-aligned; current code relies on full-dim blocks for odd H (perf only).
    w_ih_p = jnp.transpose(w_ih, (1, 0, 2)).reshape(C, G)   # (C, 4H)
    w_hh_p = jnp.transpose(w_hh, (1, 0, 2)).reshape(H, G)   # (H, 4H)
    b_p = b.reshape(1, G).astype(jnp.float32)                # (1, 4H)

    x2 = x.reshape(R, C)
    shift_row = x2[0:1, :].astype(jnp.float32)               # variance anchor

    # ---- Pass 1: BN statistics over the SequenceWise collapse (T*N, C).
    tile_s = R if R <= 1024 else 1024
    sums, sqs = pl.pallas_call(
        functools.partial(bn_stats_kernel, tile_rows=tile_s, total_rows=R),
        grid=(pl.cdiv(R, tile_s),),
        in_specs=[pl.BlockSpec((tile_s, C), lambda r: (r, 0)),
                  pl.BlockSpec((1, C), lambda r: (0, 0),
                               pipeline_mode=pl.Buffered(1))],
        out_specs=[pl.BlockSpec((1, C), lambda r: (0, 0)),
                   pl.BlockSpec((1, C), lambda r: (0, 0))],
        out_shape=(jax.ShapeDtypeStruct((1, C), jnp.float32),
                   jax.ShapeDtypeStruct((1, C), jnp.float32)),
        compiler_params=pltpu.CompilerParams(
            dimension_semantics=("arbitrary",),
            vmem_limit_bytes=VMEM_LIMIT_BYTES),
    )(x2, shift_row)

    # ---- Fold BN (training-mode, biased variance) + bias into the projection:
    #      x_norm @ W + b  ==  x @ (scale*W) + (shift @ W + b).
    mean = shift_row + sums / R
    var = jnp.maximum(sqs / R - (sums / R) ** 2, 0.0)
    inv_std = lax.rsqrt(var + BN_EPS)
    scale = gamma.reshape(1, C).astype(jnp.float32) * inv_std     # (1, C)
    shift_bn = beta.reshape(1, C).astype(jnp.float32) - mean * scale
    w_in_eff = (w_ih_p * scale.reshape(C, 1)).astype(MATMUL_DTYPE)
    b_eff = b_p + shift_bn @ w_ih_p                               # (1, 4H), f32

    # ---- Recurrence tiling (static, generation-aware) -----------------------
    tile_t = T if T <= 32 else 32
    if _IS_V7X and N >= 128 and (N // 2) % 8 == 0:
        tile_n = N // 2            # one batch tile per v7x TensorCore
    else:
        tile_n = N                 # single fat tile: full MXU M-dimension

    def _rec_vmem(tt, tn):
        xp = 2 * tt * tn * G * _XP_BYTES       # xproj block, double-buffered
        outb = 2 * tt * tn * H * 4             # out block, double-buffered
        whh = H * G * _MM_BYTES                # W_hh, Buffered(1)
        state = 2 * tn * H * 4                 # h/c scratch
        return xp + outb + whh + state

    budget = int(VMEM_LIMIT_BYTES * 0.85)
    while tile_t > 1 and _rec_vmem(tile_t, tile_n) > budget:
        tile_t = max(1, tile_t // 2)
    while (_rec_vmem(tile_t, tile_n) > budget and tile_n % 2 == 0
           and (tile_n // 2) % 8 == 0):
        tile_n //= 2

    n_t = pl.cdiv(T, tile_t)
    t_pad = n_t * tile_t
    R_pad = t_pad * N

    # ---- Pass 2: hoisted, grid-parallel input projection on (T*N, C).
    # Pad the small collapsed input (rows map to whole trailing timesteps)
    # instead of jnp.pad-ing the big (T*N, 4H) slab afterwards.
    x2p = x2 if R_pad == R else jnp.pad(x2, ((0, R_pad - R), (0, 0)))

    tile_r = R_pad if R_pad <= 1024 else 1024
    if G > 2048 and G % 512 == 0:
        tile_g = 512               # bound the weight block at production H
    else:
        tile_g = G
    w_pmode = pl.Buffered(1) if tile_g == G else None   # constant index map

    xproj = pl.pallas_call(
        input_proj_kernel,
        grid=(pl.cdiv(R_pad, tile_r), G // tile_g),
        in_specs=[pl.BlockSpec((tile_r, C), lambda r, g: (r, 0)),
                  pl.BlockSpec((C, tile_g), lambda r, g: (0, g),
                               pipeline_mode=w_pmode),
                  pl.BlockSpec((1, tile_g), lambda r, g: (0, g),
                               pipeline_mode=w_pmode)],
        out_specs=pl.BlockSpec((tile_r, tile_g), lambda r, g: (r, g)),
        out_shape=jax.ShapeDtypeStruct((R_pad, G), XPROJ_DTYPE),
        compiler_params=pltpu.CompilerParams(
            dimension_semantics=("parallel", "parallel"),
            vmem_limit_bytes=VMEM_LIMIT_BYTES),
    )(x2p, w_in_eff, b_eff)
    xproj = xproj.reshape(t_pad, N, G)

    # ---- Pass 3: LSTM recurrence, tile_t timesteps x tile_n batch per step.
    # (Padded tail timesteps run through the recurrence with finite b_eff-only
    #  inputs; their h/c and outputs are discarded by the final slice.)
    w_hh_mm = w_hh_p.astype(MATMUL_DTYPE)
    unroll = tile_t if tile_t <= 8 else 4

    out = pl.pallas_call(
        functools.partial(lstm_tile_kernel, tile_t=tile_t, hidden=H,
                          unroll=unroll),
        out_shape=jax.ShapeDtypeStruct((t_pad, N, H), jnp.float32),
        grid_spec=pltpu.PrefetchScalarGridSpec(
            num_scalar_prefetch=0,
            grid=(N // tile_n, n_t),
            in_specs=[
                pl.BlockSpec((tile_t, tile_n, G), lambda n, t: (t, n, 0)),
                pl.BlockSpec((H, G), lambda n, t: (0, 0),
                             pipeline_mode=pl.Buffered(1)),
            ],
            out_specs=pl.BlockSpec((tile_t, tile_n, H), lambda n, t: (t, n, 0)),
            scratch_shapes=[pltpu.VMEM((tile_n, H), jnp.float32),   # h
                            pltpu.VMEM((tile_n, H), jnp.float32)],  # c
        ),
        compiler_params=pltpu.CompilerParams(
            dimension_semantics=("parallel", "arbitrary"),
            vmem_limit_bytes=VMEM_LIMIT_BYTES),
    )(xproj, w_hh_mm)

    if t_pad != T:
        out = out[:T]
    return out


# --------------------------------------------------------------------------
# Pure-JAX reference (same math) for correctness.
# --------------------------------------------------------------------------
def batch_rnn_reference(x, gamma, beta, w_ih, w_hh, b):
    xf = x.astype(jnp.float32)
    mean = jnp.mean(xf, axis=(0, 1), keepdims=True)
    var = jnp.mean((xf - mean) ** 2, axis=(0, 1), keepdims=True)
    xn = (xf - mean) / jnp.sqrt(var + BN_EPS) * gamma + beta

    N = x.shape[1]
    H = w_hh.shape[-1]
    h0 = jnp.zeros((N, H), jnp.float32)
    c0 = jnp.zeros((N, H), jnp.float32)

    def step(carry, x_t):
        h, c = carry
        i = jax.nn.sigmoid(x_t @ w_ih[0] + h @ w_hh[0] + b[0])
        f = jax.nn.sigmoid(x_t @ w_ih[1] + h @ w_hh[1] + b[1])
        g = jnp.tanh(x_t @ w_ih[2] + h @ w_hh[2] + b[2])
        o = jax.nn.sigmoid(x_t @ w_ih[3] + h @ w_hh[3] + b[3])
        c_new = f * c + i * g
        h_new = o * jnp.tanh(c_new)
        return (h_new, c_new), h_new

    _, ys = lax.scan(step, (h0, c0), xn)
    return ys


if __name__ == "__main__":
    T, N, INPUT, HIDDEN = 8, 2, 16, 32

    key = jax.random.PRNGKey(0)
    kx, kg, kb, kwi, kwh, kbi = jax.random.split(key, 6)

    x = jax.random.normal(kx, (T, N, INPUT), dtype=jnp.float32)
    gamma = (1.0 + 0.1 * jax.random.normal(kg, (1, 1, INPUT))).astype(jnp.float32)
    beta = (0.1 * jax.random.normal(kb, (1, 1, INPUT))).astype(jnp.float32)

    bound = 1.0 / np.sqrt(HIDDEN)
    w_ih = jax.random.uniform(kwi, (4, INPUT, HIDDEN), jnp.float32, -bound, bound)
    w_hh = jax.random.uniform(kwh, (4, HIDDEN, HIDDEN), jnp.float32, -bound, bound)
    b = jax.random.uniform(kbi, (4, 1, HIDDEN), jnp.float32, -2 * bound, 2 * bound)

    out = jax.block_until_ready(batch_rnn_forward(x, gamma, beta, w_ih, w_hh, b))
    ref = jax.block_until_ready(batch_rnn_reference(x, gamma, beta, w_ih, w_hh, b))

    # bf16 matmul inputs / bf16 xproj slab -> looser tolerance vs. f32 reference.
    tol = 3e-2 if MATMUL_DTYPE == jnp.bfloat16 else 5e-4
    np.testing.assert_allclose(np.asarray(out), np.asarray(ref), rtol=tol, atol=tol)

    print("KERNEL_OK")
</pallas_src>

<mosaic_0001>
module attributes {stable_mosaic.version = 11 : i64} {
  func.func @bn_stats_kernel(%arg0: i32, %arg1: memref<16x16xf32, #tpu.memory_space<vmem>>, %arg2: memref<1x16xf32, #tpu.memory_space<vmem>>, %arg3: memref<1x16xf32, #tpu.memory_space<vmem>>, %arg4: memref<1x16xf32, #tpu.memory_space<vmem>>) attributes {dimension_semantics = [#tpu.dimension_semantics<arbitrary>], iteration_bounds = array<i64: 1>, scalar_prefetch = 0 : i64, scratch_operands = 0 : i64, tpu.core_type = #tpu.core_type<tc>, window_params = [{transform_indices = @transform_0, window_bounds = array<i64: 16, 16>}, {pipeline_mode = #tpu.pipeline_mode<synchronous>, transform_indices = @transform_1, window_bounds = array<i64: 1, 16>}, {pipeline_mode = #tpu.pipeline_mode<synchronous>, transform_indices = @transform_2, window_bounds = array<i64: 1, 16>}, {pipeline_mode = #tpu.pipeline_mode<synchronous>, transform_indices = @transform_3, window_bounds = array<i64: 1, 16>}]} {
    %c0_i32 = arith.constant 0 : i32
    %0 = arith.cmpi eq, %arg0, %c0_i32 : i32
    %1 = arith.extui %0 : i1 to i32
    %c0_i32_0 = arith.constant 0 : i32
    %2 = arith.cmpi ne, %1, %c0_i32_0 : i32
    scf.if %2 {
      %cst_13 = arith.constant 0.000000e+00 : f32
      %18 = vector.broadcast %cst_13 : f32 to vector<1x16xf32>
      %c0_14 = arith.constant 0 : index
      %c0_15 = arith.constant 0 : index
      %19 = vector.load %arg3[%c0_14, %c0_15] : memref<1x16xf32, #tpu.memory_space<vmem>>, vector<1x16xf32>
      tpu.vector_store %arg3[%c0_14, %c0_15], %18 {strides = array<i32>} : memref<1x16xf32, #tpu.memory_space<vmem>>, vector<1x16xf32>,
      %cst_16 = arith.constant 0.000000e+00 : f32
      %20 = vector.broadcast %cst_16 : f32 to vector<1x16xf32>
      %c0_17 = arith.constant 0 : index
      %c0_18 = arith.constant 0 : index
      %21 = vector.load %arg4[%c0_17, %c0_18] : memref<1x16xf32, #tpu.memory_space<vmem>>, vector<1x16xf32>
      tpu.vector_store %arg4[%c0_17, %c0_18], %20 {strides = array<i32>} : memref<1x16xf32, #tpu.memory_space<vmem>>, vector<1x16xf32>,
    } else {
    }
    %c0 = arith.constant 0 : index
    %c0_1 = arith.constant 0 : index
    %3 = vector.load %arg1[%c0, %c0_1] : memref<16x16xf32, #tpu.memory_space<vmem>>, vector<16x16xf32>
    %c0_2 = arith.constant 0 : index
    %c0_3 = arith.constant 0 : index
    %4 = vector.load %arg2[%c0_2, %c0_3] : memref<1x16xf32, #tpu.memory_space<vmem>>, vector<1x16xf32>
    %5 = vector.broadcast %4 : vector<1x16xf32> to vector<16x16xf32>
    %6 = arith.subf %3, %5 : vector<16x16xf32>
    %c0_4 = arith.constant 0 : index
    %c0_5 = arith.constant 0 : index
    %7 = vector.load %arg3[%c0_4, %c0_5] : memref<1x16xf32, #tpu.memory_space<vmem>>, vector<1x16xf32>
    %cst = arith.constant dense<0.000000e+00> : vector<16xf32>
    %8 = vector.multi_reduction <add>, %6, %cst [0] : vector<16x16xf32> to vector<16xf32>
    %9 = vector.shape_cast %8 : vector<16xf32> to vector<1x16xf32>
    %10 = arith.addf %7, %9 : vector<1x16xf32>
    %c0_6 = arith.constant 0 : index
    %c0_7 = arith.constant 0 : index
    %11 = vector.load %arg3[%c0_6, %c0_7] : memref<1x16xf32, #tpu.memory_space<vmem>>, vector<1x16xf32>
    tpu.vector_store %arg3[%c0_6, %c0_7], %10 {strides = array<i32>} : memref<1x16xf32, #tpu.memory_space<vmem>>, vector<1x16xf32>,
    %c0_8 = arith.constant 0 : index
    %c0_9 = arith.constant 0 : index
    %12 = vector.load %arg4[%c0_8, %c0_9] : memref<1x16xf32, #tpu.memory_space<vmem>>, vector<1x16xf32>
    %13 = arith.mulf %6, %6 : vector<16x16xf32>
    %cst_10 = arith.constant dense<0.000000e+00> : vector<16xf32>
    %14 = vector.multi_reduction <add>, %13, %cst_10 [0] : vector<16x16xf32> to vector<16xf32>
    %15 = vector.shape_cast %14 : vector<16xf32> to vector<1x16xf32>
    %16 = arith.addf %12, %15 : vector<1x16xf32>
    %c0_11 = arith.constant 0 : index
    %c0_12 = arith.constant 0 : index
    %17 = vector.load %arg4[%c0_11, %c0_12] : memref<1x16xf32, #tpu.memory_space<vmem>>, vector<1x16xf32>
    tpu.vector_store %arg4[%c0_11, %c0_12], %16 {strides = array<i32>} : memref<1x16xf32, #tpu.memory_space<vmem>>, vector<1x16xf32>,
    return
  }
  func.func @transform_0(%arg0: i32) -> (i32, i32) {
    %c0_i32 = arith.constant 0 : i32
    %c0_i32_0 = arith.constant 0 : i32
    return %arg0, %c0_i32 : i32, i32
  }
  func.func @transform_1(%arg0: i32) -> (i32, i32) {
    %c0_i32 = arith.constant 0 : i32
    %c0_i32_0 = arith.constant 0 : i32
    %c0_i32_1 = arith.constant 0 : i32
    return %c0_i32, %c0_i32_0 : i32, i32
  }
  func.func @transform_2(%arg0: i32) -> (i32, i32) {
    %c0_i32 = arith.constant 0 : i32
    %c0_i32_0 = arith.constant 0 : i32
    %c0_i32_1 = arith.constant 0 : i32
    return %c0_i32, %c0_i32_0 : i32, i32
  }
  func.func @transform_3(%arg0: i32) -> (i32, i32) {
    %c0_i32 = arith.constant 0 : i32
    %c0_i32_0 = arith.constant 0 : i32
    %c0_i32_1 = arith.constant 0 : i32
    return %c0_i32, %c0_i32_0 : i32, i32
  }
}

module attributes {stable_mosaic.version = 11 : i64} {
  func.func @input_proj_kernel(%arg0: i32, %arg1: i32, %arg2: memref<16x16xf32, #tpu.memory_space<vmem>>, %arg3: memref<16x128xbf16, #tpu.memory_space<vmem>>, %arg4: memref<1x128xf32, #tpu.memory_space<vmem>>, %arg5: memref<16x128xbf16, #tpu.memory_space<vmem>>) attributes {dimension_semantics = [#tpu.dimension_semantics<parallel>, #tpu.dimension_semantics<parallel>], iteration_bounds = array<i64: 1, 1>, scalar_prefetch = 0 : i64, scratch_operands = 0 : i64, tpu.core_type = #tpu.core_type<tc>, window_params = [{transform_indices = @transform_0, window_bounds = array<i64: 16, 16>}, {pipeline_mode = #tpu.pipeline_mode<synchronous>, transform_indices = @transform_1, window_bounds = array<i64: 16, 128>}, {pipeline_mode = #tpu.pipeline_mode<synchronous>, transform_indices = @transform_2, window_bounds = array<i64: 1, 128>}, {transform_indices = @transform_3, window_bounds = array<i64: 16, 128>}]} {
    %c0 = arith.constant 0 : index
    %c0_0 = arith.constant 0 : index
    %0 = vector.load %arg2[%c0, %c0_0] : memref<16x16xf32, #tpu.memory_space<vmem>>, vector<16x16xf32>
    %1 = arith.truncf %0 : vector<16x16xf32> to vector<16x16xbf16>
    %c0_1 = arith.constant 0 : index
    %c0_2 = arith.constant 0 : index
    %2 = vector.load %arg3[%c0_1, %c0_2] : memref<16x128xbf16, #tpu.memory_space<vmem>>, vector<16x128xbf16>
    %cst = arith.constant dense<0.000000e+00> : vector<16x128xf32>
    %3 = tpu.matmul %1, %2, %cst {dimension_numbers = #tpu.dot_dimension_numbers<[1], [0], [0], [1], [0, 0, 1, 1], [], []>} : vector<16x16xbf16>, vector<16x128xbf16>, vector<16x128xf32> -> vector<16x128xf32>
    %c0_3 = arith.constant 0 : index
    %c0_4 = arith.constant 0 : index
    %4 = vector.load %arg4[%c0_3, %c0_4] : memref<1x128xf32, #tpu.memory_space<vmem>>, vector<1x128xf32>
    %5 = vector.broadcast %4 : vector<1x128xf32> to vector<16x128xf32>
    %6 = arith.addf %3, %5 : vector<16x128xf32>
    %7 = arith.truncf %6 : vector<16x128xf32> to vector<16x128xbf16>
    %c0_5 = arith.constant 0 : index
    %c0_6 = arith.constant 0 : index
    %8 = vector.load %arg5[%c0_5, %c0_6] : memref<16x128xbf16, #tpu.memory_space<vmem>>, vector<16x128xbf16>
    tpu.vector_store %arg5[%c0_5, %c0_6], %7 {strides = array<i32>} : memref<16x128xbf16, #tpu.memory_space<vmem>>, vector<16x128xbf16>,
    return
  }
  func.func @transform_0(%arg0: i32, %arg1: i32) -> (i32, i32) {
    %c0_i32 = arith.constant 0 : i32
    %c0_i32_0 = arith.constant 0 : i32
    return %arg0, %c0_i32 : i32, i32
  }
  func.func @transform_1(%arg0: i32, %arg1: i32) -> (i32, i32) {
    %c0_i32 = arith.constant 0 : i32
    %c0_i32_0 = arith.constant 0 : i32
    return %c0_i32, %arg1 : i32, i32
  }
  func.func @transform_2(%arg0: i32, %arg1: i32) -> (i32, i32) {
    %c0_i32 = arith.constant 0 : i32
    %c0_i32_0 = arith.constant 0 : i32
    return %c0_i32, %arg1 : i32, i32
  }
  func.func @transform_3(%arg0: i32, %arg1: i32) -> (i32, i32) {
    %c0_i32 = arith.constant 0 : i32
    return %arg0, %arg1 : i32, i32
  }
}

module attributes {stable_mosaic.version = 11 : i64} {
  func.func @lstm_tile_kernel(%arg0: i32, %arg1: i32, %arg2: memref<8x2x128xbf16, #tpu.memory_space<vmem>>, %arg3: memref<32x128xbf16, #tpu.memory_space<vmem>>, %arg4: memref<8x2x32xf32, #tpu.memory_space<vmem>>, %arg5: memref<2x32xf32, #tpu.memory_space<vmem>>, %arg6: memref<2x32xf32, #tpu.memory_space<vmem>>) attributes {dimension_semantics = [#tpu.dimension_semantics<parallel>, #tpu.dimension_semantics<arbitrary>], iteration_bounds = array<i64: 1, 1>, scalar_prefetch = 0 : i64, scratch_operands = 2 : i64, tpu.core_type = #tpu.core_type<tc>, window_params = [{transform_indices = @transform_0, window_bounds = array<i64: 8, 2, 128>}, {pipeline_mode = #tpu.pipeline_mode<synchronous>, transform_indices = @transform_1, window_bounds = array<i64: 32, 128>}, {transform_indices = @transform_2, window_bounds = array<i64: 8, 2, 32>}]} {
    %c0_i32 = arith.constant 0 : i32
    %0 = arith.cmpi eq, %arg1, %c0_i32 : i32
    %1 = arith.extui %0 : i1 to i32
    %c0_i32_0 = arith.constant 0 : i32
    %2 = arith.cmpi ne, %1, %c0_i32_0 : i32
    scf.if %2 {
      %cst_66 = arith.constant 0.000000e+00 : f32
      %264 = vector.broadcast %cst_66 : f32 to vector<2x32xf32>
      %c0_67 = arith.constant 0 : index
      %c0_68 = arith.constant 0 : index
      %265 = vector.load %arg5[%c0_67, %c0_68] : memref<2x32xf32, #tpu.memory_space<vmem>>, vector<2x32xf32>
      tpu.vector_store %arg5[%c0_67, %c0_68], %264 {strides = array<i32>} : memref<2x32xf32, #tpu.memory_space<vmem>>, vector<2x32xf32>,
      %cst_69 = arith.constant 0.000000e+00 : f32
      %266 = vector.broadcast %cst_69 : f32 to vector<2x32xf32>
      %c0_70 = arith.constant 0 : index
      %c0_71 = arith.constant 0 : index
      %267 = vector.load %arg6[%c0_70, %c0_71] : memref<2x32xf32, #tpu.memory_space<vmem>>, vector<2x32xf32>
      tpu.vector_store %arg6[%c0_70, %c0_71], %266 {strides = array<i32>} : memref<2x32xf32, #tpu.memory_space<vmem>>, vector<2x32xf32>,
    } else {
    }
    %c0 = arith.constant 0 : index
    %c0_1 = arith.constant 0 : index
    %3 = vector.load %arg3[%c0, %c0_1] : memref<32x128xbf16, #tpu.memory_space<vmem>>, vector<32x128xbf16>
    %c0_2 = arith.constant 0 : index
    %c0_3 = arith.constant 0 : index
    %4 = vector.load %arg5[%c0_2, %c0_3] : memref<2x32xf32, #tpu.memory_space<vmem>>, vector<2x32xf32>
    %c0_4 = arith.constant 0 : index
    %c0_5 = arith.constant 0 : index
    %5 = vector.load %arg6[%c0_4, %c0_5] : memref<2x32xf32, #tpu.memory_space<vmem>>, vector<2x32xf32>
    %c0_i32_6 = arith.constant 0 : i32
    %6 = arith.index_cast %c0_i32_6 : i32 to index
    %c0_7 = arith.constant 0 : index
    %c0_8 = arith.constant 0 : index
    %7 = vector.load %arg2[%6, %c0_7, %c0_8] : memref<8x2x128xbf16, #tpu.memory_space<vmem>>, vector<1x2x128xbf16>
    %8 = vector.shape_cast %7 : vector<1x2x128xbf16> to vector<2x128xbf16>
    %9 = arith.extf %8 : vector<2x128xbf16> to vector<2x128xf32>
    %10 = arith.truncf %4 : vector<2x32xf32> to vector<2x32xbf16>
    %cst = arith.constant dense<0.000000e+00> : vector<2x128xf32>
    %11 = tpu.matmul %10, %3, %cst {dimension_numbers = #tpu.dot_dimension_numbers<[1], [0], [0], [1], [0, 0, 1, 1], [], []>} : vector<2x32xbf16>, vector<32x128xbf16>, vector<2x128xf32> -> vector<2x128xf32>
    %12 = arith.addf %9, %11 : vector<2x128xf32>
    %13 = vector.extract_strided_slice %12 {offsets = [0, 0], sizes = [2, 64], strides = [1, 1]} : vector<2x128xf32> to vector<2x64xf32>
    %14 = arith.negf %13 : vector<2x64xf32>
    %15 = math.exp %14 : vector<2x64xf32>
    %cst_9 = arith.constant 1.000000e+00 : f32
    %16 = vector.broadcast %cst_9 : f32 to vector<2x64xf32>
    %17 = arith.addf %16, %15 : vector<2x64xf32>
    %18 = arith.divf %16, %17 : vector<2x64xf32>
    %19 = vector.extract_strided_slice %18 {offsets = [0, 0], sizes = [2, 32], strides = [1, 1]} : vector<2x64xf32> to vector<2x32xf32>
    %20 = vector.extract_strided_slice %18 {offsets = [0, 32], sizes = [2, 32], strides = [1, 1]} : vector<2x64xf32> to vector<2x32xf32>
    %21 = vector.extract_strided_slice %12 {offsets = [0, 64], sizes = [2, 32], strides = [1, 1]} : vector<2x128xf32> to vector<2x32xf32>
    %22 = math.tanh %21 : vector<2x32xf32>
    %23 = vector.extract_strided_slice %12 {offsets = [0, 96], sizes = [2, 32], strides = [1, 1]} : vector<2x128xf32> to vector<2x32xf32>
    %24 = arith.negf %23 : vector<2x32xf32>
    %25 = math.exp %24 : vector<2x32xf32>
    %cst_10 = arith.constant 1.000000e+00 : f32
    %26 = vector.broadcast %cst_10 : f32 to vector<2x32xf32>
    %27 = arith.addf %26, %25 : vector<2x32xf32>
    %28 = arith.divf %26, %27 : vector<2x32xf32>
    %29 = arith.mulf %20, %5 : vector<2x32xf32>
    %30 = arith.mulf %19, %22 : vector<2x32xf32>
    %31 = arith.addf %29, %30 : vector<2x32xf32>
    %32 = math.tanh %31 : vector<2x32xf32>
    %33 = arith.mulf %28, %32 : vector<2x32xf32>
    %34 = arith.index_cast %c0_i32_6 : i32 to index
    %c0_11 = arith.constant 0 : index
    %c0_12 = arith.constant 0 : index
    %35 = vector.load %arg4[%34, %c0_11, %c0_12] : memref<8x2x32xf32, #tpu.memory_space<vmem>>, vector<1x2x32xf32>
    %36 = vector.shape_cast %35 : vector<1x2x32xf32> to vector<2x32xf32>
    %37 = vector.shape_cast %33 : vector<2x32xf32> to vector<1x2x32xf32>
    tpu.vector_store %arg4[%34, %c0_11, %c0_12], %37 {strides = array<i32>} : memref<8x2x32xf32, #tpu.memory_space<vmem>>, vector<1x2x32xf32>,
    %c1_i32 = arith.constant 1 : i32
    %38 = arith.index_cast %c1_i32 : i32 to index
    %c0_13 = arith.constant 0 : index
    %c0_14 = arith.constant 0 : index
    %39 = vector.load %arg2[%38, %c0_13, %c0_14] : memref<8x2x128xbf16, #tpu.memory_space<vmem>>, vector<1x2x128xbf16>
    %40 = vector.shape_cast %39 : vector<1x2x128xbf16> to vector<2x128xbf16>
    %41 = arith.extf %40 : vector<2x128xbf16> to vector<2x128xf32>
    %42 = arith.truncf %33 : vector<2x32xf32> to vector<2x32xbf16>
    %cst_15 = arith.constant dense<0.000000e+00> : vector<2x128xf32>
    %43 = tpu.matmul %42, %3, %cst_15 {dimension_numbers = #tpu.dot_dimension_numbers<[1], [0], [0], [1], [0, 0, 1, 1], [], []>} : vector<2x32xbf16>, vector<32x128xbf16>, vector<2x128xf32> -> vector<2x128xf32>
    %44 = arith.addf %41, %43 : vector<2x128xf32>
    %45 = vector.extract_strided_slice %44 {offsets = [0, 0], sizes = [2, 64], strides = [1, 1]} : vector<2x128xf32> to vector<2x64xf32>
    %46 = arith.negf %45 : vector<2x64xf32>
    %47 = math.exp %46 : vector<2x64xf32>
    %cst_16 = arith.constant 1.000000e+00 : f32
    %48 = vector.broadcast %cst_16 : f32 to vector<2x64xf32>
    %49 = arith.addf %48, %47 : vector<2x64xf32>
    %50 = arith.divf %48, %49 : vector<2x64xf32>
    %51 = vector.extract_strided_slice %50 {offsets = [0, 0], sizes = [2, 32], strides = [1, 1]} : vector<2x64xf32> to vector<2x32xf32>
    %52 = vector.extract_strided_slice %50 {offsets = [0, 32], sizes = [2, 32], strides = [1, 1]} : vector<2x64xf32> to vector<2x32xf32>
    %53 = vector.extract_strided_slice %44 {offsets = [0, 64], sizes = [2, 32], strides = [1, 1]} : vector<2x128xf32> to vector<2x32xf32>
    %54 = math.tanh %53 : vector<2x32xf32>
    %55 = vector.extract_strided_slice %44 {offsets = [0, 96], sizes = [2, 32], strides = [1, 1]} : vector<2x128xf32> to vector<2x32xf32>
    %56 = arith.negf %55 : vector<2x32xf32>
    %57 = math.exp %56 : vector<2x32xf32>
    %cst_17 = arith.constant 1.000000e+00 : f32
    %58 = vector.broadcast %cst_17 : f32 to vector<2x32xf32>
    %59 = arith.addf %58, %57 : vector<2x32xf32>
    %60 = arith.divf %58, %59 : vector<2x32xf32>
    %61 = arith.mulf %52, %31 : vector<2x32xf32>
    %62 = arith.mulf %51, %54 : vector<2x32xf32>
    %63 = arith.addf %61, %62 : vector<2x32xf32>
    %64 = math.tanh %63 : vector<2x32xf32>
    %65 = arith.mulf %60, %64 : vector<2x32xf32>
    %66 = arith.index_cast %c1_i32 : i32 to index
    %c0_18 = arith.constant 0 : index
    %c0_19 = arith.constant 0 : index
    %67 = vector.load %arg4[%66, %c0_18, %c0_19] : memref<8x2x32xf32, #tpu.memory_space<vmem>>, vector<1x2x32xf32>
    %68 = vector.shape_cast %67 : vector<1x2x32xf32> to vector<2x32xf32>
    %69 = vector.shape_cast %65 : vector<2x32xf32> to vector<1x2x32xf32>
    tpu.vector_store %arg4[%66, %c0_18, %c0_19], %69 {strides = array<i32>} : memref<8x2x32xf32, #tpu.memory_space<vmem>>, vector<1x2x32xf32>,
    %c2_i32 = arith.constant 2 : i32
    %70 = arith.index_cast %c2_i32 : i32 to index
    %c0_20 = arith.constant 0 : index
    %c0_21 = arith.constant 0 : index
    %71 = vector.load %arg2[%70, %c0_20, %c0_21] : memref<8x2x128xbf16, #tpu.memory_space<vmem>>, vector<1x2x128xbf16>
    %72 = vector.shape_cast %71 : vector<1x2x128xbf16> to vector<2x128xbf16>
    %73 = arith.extf %72 : vector<2x128xbf16> to vector<2x128xf32>
    %74 = arith.truncf %65 : vector<2x32xf32> to vector<2x32xbf16>
    %cst_22 = arith.constant dense<0.000000e+00> : vector<2x128xf32>
    %75 = tpu.matmul %74, %3, %cst_22 {dimension_numbers = #tpu.dot_dimension_numbers<[1], [0], [0], [1], [0, 0, 1, 1], [], []>} : vector<2x32xbf16>, vector<32x128xbf16>, vector<2x128xf32> -> vector<2x128xf32>
    %76 = arith.addf %73, %75 : vector<2x128xf32>
    %77 = vector.extract_strided_slice %76 {offsets = [0, 0], sizes = [2, 64], strides = [1, 1]} : vector<2x128xf32> to vector<2x64xf32>
    %78 = arith.negf %77 : vector<2x64xf32>
    %79 = math.exp %78 : vector<2x64xf32>
    %cst_23 = arith.constant 1.000000e+00 : f32
    %80 = vector.broadcast %cst_23 : f32 to vector<2x64xf32>
    %81 = arith.addf %80, %79 : vector<2x64xf32>
    %82 = arith.divf %80, %81 : vector<2x64xf32>
    %83 = vector.extract_strided_slice %82 {offsets = [0, 0], sizes = [2, 32], strides = [1, 1]} : vector<2x64xf32> to vector<2x32xf32>
    %84 = vector.extract_strided_slice %82 {offsets = [0, 32], sizes = [2, 32], strides = [1, 1]} : vector<2x64xf32> to vector<2x32xf32>
    %85 = vector.extract_strided_slice %76 {offsets = [0, 64], sizes = [2, 32], strides = [1, 1]} : vector<2x128xf32> to vector<2x32xf32>
    %86 = math.tanh %85 : vector<2x32xf32>
    %87 = vector.extract_strided_slice %76 {offsets = [0, 96], sizes = [2, 32], strides = [1, 1]} : vector<2x128xf32> to vector<2x32xf32>
    %88 = arith.negf %87 : vector<2x32xf32>
    %89 = math.exp %88 : vector<2x32xf32>
    %cst_24 = arith.constant 1.000000e+00 : f32
    %90 = vector.broadcast %cst_24 : f32 to vector<2x32xf32>
    %91 = arith.addf %90, %89 : vector<2x32xf32>
    %92 = arith.divf %90, %91 : vector<2x32xf32>
    %93 = arith.mulf %84, %63 : vector<2x32xf32>
    %94 = arith.mulf %83, %86 : vector<2x32xf32>
    %95 = arith.addf %93, %94 : vector<2x32xf32>
    %96 = math.tanh %95 : vector<2x32xf32>
    %97 = arith.mulf %92, %96 : vector<2x32xf32>
    %98 = arith.index_cast %c2_i32 : i32 to index
    %c0_25 = arith.constant 0 : index
    %c0_26 = arith.constant 0 : index
    %99 = vector.load %arg4[%98, %c0_25, %c0_26] : memref<8x2x32xf32, #tpu.memory_space<vmem>>, vector<1x2x32xf32>
    %100 = vector.shape_cast %99 : vector<1x2x32xf32> to vector<2x32xf32>
    %101 = vector.shape_cast %97 : vector<2x32xf32> to vector<1x2x32xf32>
    tpu.vector_store %arg4[%98, %c0_25, %c0_26], %101 {strides = array<i32>} : memref<8x2x32xf32, #tpu.memory_space<vmem>>, vector<1x2x32xf32>,
    %c3_i32 = arith.constant 3 : i32
    %102 = arith.index_cast %c3_i32 : i32 to index
    %c0_27 = arith.constant 0 : index
    %c0_28 = arith.constant 0 : index
    %103 = vector.load %arg2[%102, %c0_27, %c0_28] : memref<8x2x128xbf16, #tpu.memory_space<vmem>>, vector<1x2x128xbf16>
    %104 = vector.shape_cast %103 : vector<1x2x128xbf16> to vector<2x128xbf16>
    %105 = arith.extf %104 : vector<2x128xbf16> to vector<2x128xf32>
    %106 = arith.truncf %97 : vector<2x32xf32> to vector<2x32xbf16>
    %cst_29 = arith.constant dense<0.000000e+00> : vector<2x128xf32>
    %107 = tpu.matmul %106, %3, %cst_29 {dimension_numbers = #tpu.dot_dimension_numbers<[1], [0], [0], [1], [0, 0, 1, 1], [], []>} : vector<2x32xbf16>, vector<32x128xbf16>, vector<2x128xf32> -> vector<2x128xf32>
    %108 = arith.addf %105, %107 : vector<2x128xf32>
    %109 = vector.extract_strided_slice %108 {offsets = [0, 0], sizes = [2, 64], strides = [1, 1]} : vector<2x128xf32> to vector<2x64xf32>
    %110 = arith.negf %109 : vector<2x64xf32>
    %111 = math.exp %110 : vector<2x64xf32>
    %cst_30 = arith.constant 1.000000e+00 : f32
    %112 = vector.broadcast %cst_30 : f32 to vector<2x64xf32>
    %113 = arith.addf %112, %111 : vector<2x64xf32>
    %114 = arith.divf %112, %113 : vector<2x64xf32>
    %115 = vector.extract_strided_slice %114 {offsets = [0, 0], sizes = [2, 32], strides = [1, 1]} : vector<2x64xf32> to vector<2x32xf32>
    %116 = vector.extract_strided_slice %114 {offsets = [0, 32], sizes = [2, 32], strides = [1, 1]} : vector<2x64xf32> to vector<2x32xf32>
    %117 = vector.extract_strided_slice %108 {offsets = [0, 64], sizes = [2, 32], strides = [1, 1]} : vector<2x128xf32> to vector<2x32xf32>
    %118 = math.tanh %117 : vector<2x32xf32>
    %119 = vector.extract_strided_slice %108 {offsets = [0, 96], sizes = [2, 32], strides = [1, 1]} : vector<2x128xf32> to vector<2x32xf32>
    %120 = arith.negf %119 : vector<2x32xf32>
    %121 = math.exp %120 : vector<2x32xf32>
    %cst_31 = arith.constant 1.000000e+00 : f32
    %122 = vector.broadcast %cst_31 : f32 to vector<2x32xf32>
    %123 = arith.addf %122, %121 : vector<2x32xf32>
    %124 = arith.divf %122, %123 : vector<2x32xf32>
    %125 = arith.mulf %116, %95 : vector<2x32xf32>
    %126 = arith.mulf %115, %118 : vector<2x32xf32>
    %127 = arith.addf %125, %126 : vector<2x32xf32>
    %128 = math.tanh %127 : vector<2x32xf32>
    %129 = arith.mulf %124, %128 : vector<2x32xf32>
    %130 = arith.index_cast %c3_i32 : i32 to index
    %c0_32 = arith.constant 0 : index
    %c0_33 = arith.constant 0 : index
    %131 = vector.load %arg4[%130, %c0_32, %c0_33] : memref<8x2x32xf32, #tpu.memory_space<vmem>>, vector<1x2x32xf32>
    %132 = vector.shape_cast %131 : vector<1x2x32xf32> to vector<2x32xf32>
    %133 = vector.shape_cast %129 : vector<2x32xf32> to vector<1x2x32xf32>
    tpu.vector_store %arg4[%130, %c0_32, %c0_33], %133 {strides = array<i32>} : memref<8x2x32xf32, #tpu.memory_space<vmem>>, vector<1x2x32xf32>,
    %c4_i32 = arith.constant 4 : i32
    %134 = arith.index_cast %c4_i32 : i32 to index
    %c0_34 = arith.constant 0 : index
    %c0_35 = arith.constant 0 : index
    %135 = vector.load %arg2[%134, %c0_34, %c0_35] : memref<8x2x128xbf16, #tpu.memory_space<vmem>>, vector<1x2x128xbf16>
    %136 = vector.shape_cast %135 : vector<1x2x128xbf16> to vector<2x128xbf16>
    %137 = arith.extf %136 : vector<2x128xbf16> to vector<2x128xf32>
    %138 = arith.truncf %129 : vector<2x32xf32> to vector<2x32xbf16>
    %cst_36 = arith.constant dense<0.000000e+00> : vector<2x128xf32>
    %139 = tpu.matmul %138, %3, %cst_36 {dimension_numbers = #tpu.dot_dimension_numbers<[1], [0], [0], [1], [0, 0, 1, 1], [], []>} : vector<2x32xbf16>, vector<32x128xbf16>, vector<2x128xf32> -> vector<2x128xf32>
    %140 = arith.addf %137, %139 : vector<2x128xf32>
    %141 = vector.extract_strided_slice %140 {offsets = [0, 0], sizes = [2, 64], strides = [1, 1]} : vector<2x128xf32> to vector<2x64xf32>
    %142 = arith.negf %141 : vector<2x64xf32>
    %143 = math.exp %142 : vector<2x64xf32>
    %cst_37 = arith.constant 1.000000e+00 : f32
    %144 = vector.broadcast %cst_37 : f32 to vector<2x64xf32>
    %145 = arith.addf %144, %143 : vector<2x64xf32>
    %146 = arith.divf %144, %145 : vector<2x64xf32>
    %147 = vector.extract_strided_slice %146 {offsets = [0, 0], sizes = [2, 32], strides = [1, 1]} : vector<2x64xf32> to vector<2x32xf32>
    %148 = vector.extract_strided_slice %146 {offsets = [0, 32], sizes = [2, 32], strides = [1, 1]} : vector<2x64xf32> to vector<2x32xf32>
    %149 = vector.extract_strided_slice %140 {offsets = [0, 64], sizes = [2, 32], strides = [1, 1]} : vector<2x128xf32> to vector<2x32xf32>
    %150 = math.tanh %149 : vector<2x32xf32>
    %151 = vector.extract_strided_slice %140 {offsets = [0, 96], sizes = [2, 32], strides = [1, 1]} : vector<2x128xf32> to vector<2x32xf32>
    %152 = arith.negf %151 : vector<2x32xf32>
    %153 = math.exp %152 : vector<2x32xf32>
    %cst_38 = arith.constant 1.000000e+00 : f32
    %154 = vector.broadcast %cst_38 : f32 to vector<2x32xf32>
    %155 = arith.addf %154, %153 : vector<2x32xf32>
    %156 = arith.divf %154, %155 : vector<2x32xf32>
    %157 = arith.mulf %148, %127 : vector<2x32xf32>
    %158 = arith.mulf %147, %150 : vector<2x32xf32>
    %159 = arith.addf %157, %158 : vector<2x32xf32>
    %160 = math.tanh %159 : vector<2x32xf32>
    %161 = arith.mulf %156, %160 : vector<2x32xf32>
    %162 = arith.index_cast %c4_i32 : i32 to index
    %c0_39 = arith.constant 0 : index
    %c0_40 = arith.constant 0 : index
    %163 = vector.load %arg4[%162, %c0_39, %c0_40] : memref<8x2x32xf32, #tpu.memory_space<vmem>>, vector<1x2x32xf32>
    %164 = vector.shape_cast %163 : vector<1x2x32xf32> to vector<2x32xf32>
    %165 = vector.shape_cast %161 : vector<2x32xf32> to vector<1x2x32xf32>
    tpu.vector_store %arg4[%162, %c0_39, %c0_40], %165 {strides = array<i32>} : memref<8x2x32xf32, #tpu.memory_space<vmem>>, vector<1x2x32xf32>,
    %c5_i32 = arith.constant 5 : i32
    %166 = arith.index_cast %c5_i32 : i32 to index
    %c0_41 = arith.constant 0 : index
    %c0_42 = arith.constant 0 : index
    %167 = vector.load %arg2[%166, %c0_41, %c0_42] : memref<8x2x128xbf16, #tpu.memory_space<vmem>>, vector<1x2x128xbf16>
    %168 = vector.shape_cast %167 : vector<1x2x128xbf16> to vector<2x128xbf16>
    %169 = arith.extf %168 : vector<2x128xbf16> to vector<2x128xf32>
    %170 = arith.truncf %161 : vector<2x32xf32> to vector<2x32xbf16>
    %cst_43 = arith.constant dense<0.000000e+00> : vector<2x128xf32>
    %171 = tpu.matmul %170, %3, %cst_43 {dimension_numbers = #tpu.dot_dimension_numbers<[1], [0], [0], [1], [0, 0, 1, 1], [], []>} : vector<2x32xbf16>, vector<32x128xbf16>, vector<2x128xf32> -> vector<2x128xf32>
    %172 = arith.addf %169, %171 : vector<2x128xf32>
    %173 = vector.extract_strided_slice %172 {offsets = [0, 0], sizes = [2, 64], strides = [1, 1]} : vector<2x128xf32> to vector<2x64xf32>
    %174 = arith.negf %173 : vector<2x64xf32>
    %175 = math.exp %174 : vector<2x64xf32>
    %cst_44 = arith.constant 1.000000e+00 : f32
    %176 = vector.broadcast %cst_44 : f32 to vector<2x64xf32>
    %177 = arith.addf %176, %175 : vector<2x64xf32>
    %178 = arith.divf %176, %177 : vector<2x64xf32>
    %179 = vector.extract_strided_slice %178 {offsets = [0, 0], sizes = [2, 32], strides = [1, 1]} : vector<2x64xf32> to vector<2x32xf32>
    %180 = vector.extract_strided_slice %178 {offsets = [0, 32], sizes = [2, 32], strides = [1, 1]} : vector<2x64xf32> to vector<2x32xf32>
    %181 = vector.extract_strided_slice %172 {offsets = [0, 64], sizes = [2, 32], strides = [1, 1]} : vector<2x128xf32> to vector<2x32xf32>
    %182 = math.tanh %181 : vector<2x32xf32>
    %183 = vector.extract_strided_slice %172 {offsets = [0, 96], sizes = [2, 32], strides = [1, 1]} : vector<2x128xf32> to vector<2x32xf32>
    %184 = arith.negf %183 : vector<2x32xf32>
    %185 = math.exp %184 : vector<2x32xf32>
    %cst_45 = arith.constant 1.000000e+00 : f32
    %186 = vector.broadcast %cst_45 : f32 to vector<2x32xf32>
    %187 = arith.addf %186, %185 : vector<2x32xf32>
    %188 = arith.divf %186, %187 : vector<2x32xf32>
    %189 = arith.mulf %180, %159 : vector<2x32xf32>
    %190 = arith.mulf %179, %182 : vector<2x32xf32>
    %191 = arith.addf %189, %190 : vector<2x32xf32>
    %192 = math.tanh %191 : vector<2x32xf32>
    %193 = arith.mulf %188, %192 : vector<2x32xf32>
    %194 = arith.index_cast %c5_i32 : i32 to index
    %c0_46 = arith.constant 0 : index
    %c0_47 = arith.constant 0 : index
    %195 = vector.load %arg4[%194, %c0_46, %c0_47] : memref<8x2x32xf32, #tpu.memory_space<vmem>>, vector<1x2x32xf32>
    %196 = vector.shape_cast %195 : vector<1x2x32xf32> to vector<2x32xf32>
    %197 = vector.shape_cast %193 : vector<2x32xf32> to vector<1x2x32xf32>
    tpu.vector_store %arg4[%194, %c0_46, %c0_47], %197 {strides = array<i32>} : memref<8x2x32xf32, #tpu.memory_space<vmem>>, vector<1x2x32xf32>,
    %c6_i32 = arith.constant 6 : i32
    %198 = arith.index_cast %c6_i32 : i32 to index
    %c0_48 = arith.constant 0 : index
    %c0_49 = arith.constant 0 : index
    %199 = vector.load %arg2[%198, %c0_48, %c0_49] : memref<8x2x128xbf16, #tpu.memory_space<vmem>>, vector<1x2x128xbf16>
    %200 = vector.shape_cast %199 : vector<1x2x128xbf16> to vector<2x128xbf16>
    %201 = arith.extf %200 : vector<2x128xbf16> to vector<2x128xf32>
    %202 = arith.truncf %193 : vector<2x32xf32> to vector<2x32xbf16>
    %cst_50 = arith.constant dense<0.000000e+00> : vector<2x128xf32>
    %203 = tpu.matmul %202, %3, %cst_50 {dimension_numbers = #tpu.dot_dimension_numbers<[1], [0], [0], [1], [0, 0, 1, 1], [], []>} : vector<2x32xbf16>, vector<32x128xbf16>, vector<2x128xf32> -> vector<2x128xf32>
    %204 = arith.addf %201, %203 : vector<2x128xf32>
    %205 = vector.extract_strided_slice %204 {offsets = [0, 0], sizes = [2, 64], strides = [1, 1]} : vector<2x128xf32> to vector<2x64xf32>
    %206 = arith.negf %205 : vector<2x64xf32>
    %207 = math.exp %206 : vector<2x64xf32>
    %cst_51 = arith.constant 1.000000e+00 : f32
    %208 = vector.broadcast %cst_51 : f32 to vector<2x64xf32>
    %209 = arith.addf %208, %207 : vector<2x64xf32>
    %210 = arith.divf %208, %209 : vector<2x64xf32>
    %211 = vector.extract_strided_slice %210 {offsets = [0, 0], sizes = [2, 32], strides = [1, 1]} : vector<2x64xf32> to vector<2x32xf32>
    %212 = vector.extract_strided_slice %210 {offsets = [0, 32], sizes = [2, 32], strides = [1, 1]} : vector<2x64xf32> to vector<2x32xf32>
    %213 = vector.extract_strided_slice %204 {offsets = [0, 64], sizes = [2, 32], strides = [1, 1]} : vector<2x128xf32> to vector<2x32xf32>
    %214 = math.tanh %213 : vector<2x32xf32>
    %215 = vector.extract_strided_slice %204 {offsets = [0, 96], sizes = [2, 32], strides = [1, 1]} : vector<2x128xf32> to vector<2x32xf32>
    %216 = arith.negf %215 : vector<2x32xf32>
    %217 = math.exp %216 : vector<2x32xf32>
    %cst_52 = arith.constant 1.000000e+00 : f32
    %218 = vector.broadcast %cst_52 : f32 to vector<2x32xf32>
    %219 = arith.addf %218, %217 : vector<2x32xf32>
    %220 = arith.divf %218, %219 : vector<2x32xf32>
    %221 = arith.mulf %212, %191 : vector<2x32xf32>
    %222 = arith.mulf %211, %214 : vector<2x32xf32>
    %223 = arith.addf %221, %222 : vector<2x32xf32>
    %224 = math.tanh %223 : vector<2x32xf32>
    %225 = arith.mulf %220, %224 : vector<2x32xf32>
    %226 = arith.index_cast %c6_i32 : i32 to index
    %c0_53 = arith.constant 0 : index
    %c0_54 = arith.constant 0 : index
    %227 = vector.load %arg4[%226, %c0_53, %c0_54] : memref<8x2x32xf32, #tpu.memory_space<vmem>>, vector<1x2x32xf32>
    %228 = vector.shape_cast %227 : vector<1x2x32xf32> to vector<2x32xf32>
    %229 = vector.shape_cast %225 : vector<2x32xf32> to vector<1x2x32xf32>
    tpu.vector_store %arg4[%226, %c0_53, %c0_54], %229 {strides = array<i32>} : memref<8x2x32xf32, #tpu.memory_space<vmem>>, vector<1x2x32xf32>,
    %c7_i32 = arith.constant 7 : i32
    %230 = arith.index_cast %c7_i32 : i32 to index
    %c0_55 = arith.constant 0 : index
    %c0_56 = arith.constant 0 : index
    %231 = vector.load %arg2[%230, %c0_55, %c0_56] : memref<8x2x128xbf16, #tpu.memory_space<vmem>>, vector<1x2x128xbf16>
    %232 = vector.shape_cast %231 : vector<1x2x128xbf16> to vector<2x128xbf16>
    %233 = arith.extf %232 : vector<2x128xbf16> to vector<2x128xf32>
    %234 = arith.truncf %225 : vector<2x32xf32> to vector<2x32xbf16>
    %cst_57 = arith.constant dense<0.000000e+00> : vector<2x128xf32>
    %235 = tpu.matmul %234, %3, %cst_57 {dimension_numbers = #tpu.dot_dimension_numbers<[1], [0], [0], [1], [0, 0, 1, 1], [], []>} : vector<2x32xbf16>, vector<32x128xbf16>, vector<2x128xf32> -> vector<2x128xf32>
    %236 = arith.addf %233, %235 : vector<2x128xf32>
    %237 = vector.extract_strided_slice %236 {offsets = [0, 0], sizes = [2, 64], strides = [1, 1]} : vector<2x128xf32> to vector<2x64xf32>
    %238 = arith.negf %237 : vector<2x64xf32>
    %239 = math.exp %238 : vector<2x64xf32>
    %cst_58 = arith.constant 1.000000e+00 : f32
    %240 = vector.broadcast %cst_58 : f32 to vector<2x64xf32>
    %241 = arith.addf %240, %239 : vector<2x64xf32>
    %242 = arith.divf %240, %241 : vector<2x64xf32>
    %243 = vector.extract_strided_slice %242 {offsets = [0, 0], sizes = [2, 32], strides = [1, 1]} : vector<2x64xf32> to vector<2x32xf32>
    %244 = vector.extract_strided_slice %242 {offsets = [0, 32], sizes = [2, 32], strides = [1, 1]} : vector<2x64xf32> to vector<2x32xf32>
    %245 = vector.extract_strided_slice %236 {offsets = [0, 64], sizes = [2, 32], strides = [1, 1]} : vector<2x128xf32> to vector<2x32xf32>
    %246 = math.tanh %245 : vector<2x32xf32>
    %247 = vector.extract_strided_slice %236 {offsets = [0, 96], sizes = [2, 32], strides = [1, 1]} : vector<2x128xf32> to vector<2x32xf32>
    %248 = arith.negf %247 : vector<2x32xf32>
    %249 = math.exp %248 : vector<2x32xf32>
    %cst_59 = arith.constant 1.000000e+00 : f32
    %250 = vector.broadcast %cst_59 : f32 to vector<2x32xf32>
    %251 = arith.addf %250, %249 : vector<2x32xf32>
    %252 = arith.divf %250, %251 : vector<2x32xf32>
    %253 = arith.mulf %244, %223 : vector<2x32xf32>
    %254 = arith.mulf %243, %246 : vector<2x32xf32>
    %255 = arith.addf %253, %254 : vector<2x32xf32>
    %256 = math.tanh %255 : vector<2x32xf32>
    %257 = arith.mulf %252, %256 : vector<2x32xf32>
    %258 = arith.index_cast %c7_i32 : i32 to index
    %c0_60 = arith.constant 0 : index
    %c0_61 = arith.constant 0 : index
    %259 = vector.load %arg4[%258, %c0_60, %c0_61] : memref<8x2x32xf32, #tpu.memory_space<vmem>>, vector<1x2x32xf32>
    %260 = vector.shape_cast %259 : vector<1x2x32xf32> to vector<2x32xf32>
    %261 = vector.shape_cast %257 : vector<2x32xf32> to vector<1x2x32xf32>
    tpu.vector_store %arg4[%258, %c0_60, %c0_61], %261 {strides = array<i32>} : memref<8x2x32xf32, #tpu.memory_space<vmem>>, vector<1x2x32xf32>,
    %c8_i32 = arith.constant 8 : i32
    %c0_62 = arith.constant 0 : index
    %c0_63 = arith.constant 0 : index
    %262 = vector.load %arg5[%c0_62, %c0_63] : memref<2x32xf32, #tpu.memory_space<vmem>>, vector<2x32xf32>
    tpu.vector_store %arg5[%c0_62, %c0_63], %257 {strides = array<i32>} : memref<2x32xf32, #tpu.memory_space<vmem>>, vector<2x32xf32>,
    %c0_64 = arith.constant 0 : index
    %c0_65 = arith.constant 0 : index
    %263 = vector.load %arg6[%c0_64, %c0_65] : memref<2x32xf32, #tpu.memory_space<vmem>>, vector<2x32xf32>
    tpu.vector_store %arg6[%c0_64, %c0_65], %255 {strides = array<i32>} : memref<2x32xf32, #tpu.memory_space<vmem>>, vector<2x32xf32>,
    return
  }
  func.func @transform_0(%arg0: i32, %arg1: i32) -> (i32, i32, i32) {
    %c0_i32 = arith.constant 0 : i32
    %c0_i32_0 = arith.constant 0 : i32
    return %arg1, %arg0, %c0_i32 : i32, i32, i32
  }
  func.func @transform_1(%arg0: i32, %arg1: i32) -> (i32, i32) {
    %c0_i32 = arith.constant 0 : i32
    %c0_i32_0 = arith.constant 0 : i32
    %c0_i32_1 = arith.constant 0 : i32
    return %c0_i32, %c0_i32_0 : i32, i32
  }
  func.func @transform_2(%arg0: i32, %arg1: i32) -> (i32, i32, i32) {
    %c0_i32 = arith.constant 0 : i32
    %c0_i32_0 = arith.constant 0 : i32
    return %arg1, %arg0, %c0_i32 : i32, i32, i32
  }
}

</mosaic_0001>

<bundles_post_ra>
// kernel: batch_rnn_forward.3
= control target key start
LH: loop header
LB: loop body
LE: loop exit
PB: predicated region body
PF: predicated region fallthrough
CT: control target
= control target key end

     0   :  { %9 = vsyncpa [#allocation3], 0  ;;  %s109_s12 = smov [#allocation2]   ;;  %s161_s0 = inlined_call_operand.hbm [shape: f32[16,16], index: 0, kind: input, shape index: {}]   ;;  %s162_s1 = inlined_call_operand.vmem [shape: f32[1,16], index: 1, kind: input, shape index: {}]   ;;  %s163_s2 = inlined_call_operand.vmem [shape: f32[1,16], index: 2, kind: output, shape index: {0}]   ;;  %s164_s3 = inlined_call_operand.vmem [shape: f32[1,16], index: 3, kind: output, shape index: {1}]  }
   0x1   :  { %s15_s13 = sshll.u32 %s109_s12, 4  ;;  %s16_s13 = int_to_ptr.vmem [resolvable:$true] %s15_s13 }
   0x2   :  { %s95_s14 = scalar_lea.vmem %s16_s13, 256  ;;  %p100_p1 = scmp.lt.s32.totalorder %s16_s13, %s16_s13 }
   0x3   :  { %p96_p0 = scmp.ne.s32.totalorder %s16_s13, %s95_s14  ;;  %p101_p2 = scmp.lt.s32.totalorder %s95_s14, %s95_s14 }
   0x5   :  { %p102_p3 = por %p101_p2, %p100_p1 }
   0x7   :  { %p103_p4 = pnand %p102_p3, %p96_p0 }
   0x9   :  { %106 = shalt.err (!%p103_p4)
}
   0xa   :  { %s110_s15 = smov 128   ;;  %s111_s16 = smov 8  }
   0xb   :  { %21 = dma.hbm_to_vmem [thread:$0]  %s161_s0, 256, %s16_s13, [#allocation3], %s110_s15, %s110_s15, %s111_s16  }
   0xc   :  { %107 = dma.done.wait [#allocation3], 256  }
   0xd   :  { %108 = vsyncadd [#allocation3], 4294967040  ;;  %vm31_vm0 = vcmask 122880   ;;  %v112_v0 = vmov 0.0   ;;  %v34_v1 = vld [vmem:[#allocation2] sm:$0xff]  ;;  %v35_v2 = vld [vmem:[#allocation2 + $0x8] sm:$0xff] }
   0xe   :  { %32 = vst.msk [vmem:[%s163_s2] sm:$0x1] %vm31_vm0, %v112_v0  ;;  %33 = vst.msk [vmem:[%s164_s3] sm:$0x1] %vm31_vm0, %v112_v0  ;;  %v82_v3 = vld [vmem:[%s162_s1] ss:$0 sm:$0xff] }
   0xf   :  { %vm46_vm1 = vcmask 130048   ;;  %v43_v4 = vsub.f32 %v34_v1, %v82_v3  ;;  %v44_v5 = vsub.f32 %v35_v2, %v82_v3 }
  0x11   :  { %v47_v6 = vsel %vm46_vm1, %v43_v4, 0.0  ;;  %v48_v7 = vsel %vm46_vm1, %v44_v5, 0.0  ;;  %v60_v8 = vmul.f32 %v43_v4, %v43_v4  ;;  %v61_v9 = vmul.f32 %v44_v5, %v44_v5 }
  0x12   :  { %v49_v10 = vadd.f32 %v48_v7, %v47_v6 }
  0x13   :  { %v62_v11 = vsel %vm46_vm1, %v60_v8, 0.0  ;;  %v63_v12 = vsel %vm46_vm1, %v61_v9, 0.0 }
  0x14   :  { %v50_v13 = vrot.slane %v49_v10, 4  ;;  %v64_v14 = vadd.f32 %v63_v12, %v62_v11 }
  0x15   :  { %v45_v23 = vld [vmem:[%s163_s2] sm:$0x1] }
  0x16   :  { %v51_v15 = vadd.f32 %v50_v13, %v49_v10  ;;  %v65_v16 = vrot.slane %v64_v14, 4  ;;  %v59_v26 = vld [vmem:[%s164_s3] sm:$0x1] }
  0x18   :  { %v52_v17 = vrot.slane %v51_v15, 2  ;;  %v66_v18 = vadd.f32 %v65_v16, %v64_v14 }
  0x1a   :  { %v53_v19 = vadd.f32 %v52_v17, %v51_v15  ;;  %v67_v20 = vrot.slane %v66_v18, 2 }
  0x1c   :  { %v54_v21 = vrot.slane %v53_v19, 1  ;;  %v68_v22 = vadd.f32 %v67_v20, %v66_v18 }
  0x1e   :  { %v55_v24 = vadd.f32 %v54_v21, %v53_v19  ;;  %v69_v25 = vrot.slane %v68_v22, 1 }
  0x20   :  { %v56_v27 = vadd.f32 %v55_v24, %v45_v23  ;;  %v70_v28 = vadd.f32 %v69_v25, %v68_v22 }
  0x22   :  { %58 = vst.msk [vmem:[%s163_s2] sm:$0x1] %vm31_vm0, %v56_v27  ;;  %v71_v29 = vadd.f32 %v70_v28, %v59_v26 }
  0x24   :  { %72 = vst.msk [vmem:[%s164_s3] sm:$0x1] %vm31_vm0, %v71_v29 }
  0x25   :  { %81 = vsyncpa [#allocation3], 1 }

// kernel: batch_rnn_forward.4
= control target key start
LH: loop header
LB: loop body
LE: loop exit
PB: predicated region body
PF: predicated region fallthrough
CT: control target
= control target key end

     0   :  { %v115_v0 = vmov 0.0   ;;  %vm116_vm0 = vmmov 0   ;;  %vm33_vm1 = vcmask 130048   ;;  %s152_s1 = inlined_call_operand.vmem [shape: bf16[16,128], index: 1, kind: input, shape index: {}]   ;;  %s153_s0 = inlined_call_operand.vmem [shape: f32[16,16], index: 0, kind: input, shape index: {}]   ;;  %s154_s2 = inlined_call_operand.vmem [shape: f32[1,128], index: 2, kind: input, shape index: {}]   ;;  %s155_s3 = inlined_call_operand.vmem [shape: bf16[16,128], index: 3, kind: output, shape index: {}]  }
   0x1   :  { %106 = vmatprep.subr.bf16.mxu0 %v115_v0  ;;  %v114_v1 = vld [vmem:[%s152_s1] sm:$0xff]   ;;  %108 = vmatprep.mubr.msk.bf16.mxu0 %vm116_vm0, %v115_v0  ;;  %v16_v3 = vld [vmem:[%s153_s0 + $0x8] sm:$0xff] }
   0x2   :  { %v15_v2 = vld [vmem:[%s153_s0] sm:$0xff]  ;;  %107 = vmatpush3.bf16.msra.mxu0 %v114_v1 }
   0x3   :  { %v17_v4 = vpack.c.bf16 %v16_v3, %v15_v2  ;;  %v92_v6 = vld [vmem:[%s154_s2] ss:$0 sm:$0xff] }
   0x5   :  { %109 = vmatmul.mubr.msk.bf16.vlgmr.msra.gmra.mxu0 %vm33_vm1, %v17_v4 }
  0xc5   :  { %v71_v5 = vpop.f32.mrf.mxu0 }
  0xc6   :  { %v72_v9 = vadd.f32 %v92_v6, %v71_v5 }
  0xc7   :  { %v110_v7 = vpop.f32.mrf.mxu0 }
  0xc9   :  { %v74_v8 = vpop.f32.mrf.mxu0 }
  0xca   :  { %v75_v10 = vadd.f32 %v92_v6, %v74_v8 }
  0xcb   :  { %v111_v11 = vpop.f32.mrf.mxu0 }
  0xcc   :  { %v102_v12 = vpack.c.bf16 %v75_v10, %v72_v9 }
  0xce   :  { %103 = vst [vmem:[%s155_s3] sm:$0xff] %v102_v12  }

// kernel: batch_rnn_forward.5
= control target key start
LH: loop header
LB: loop body
LE: loop exit
PB: predicated region body
PF: predicated region fallthrough
CT: control target
= control target key end

     0   :  { %v989_v1 = vmov 0.0   ;;  %vm990_vm0 = vmmov 0   ;;  %vm17_vm1 = vcmask 254976   ;;  %s1191_s0 = inlined_call_operand.vmem [shape: bf16[8,2,128], index: 0, kind: input, shape index: {}]   ;;  %s1192_s1 = inlined_call_operand.vmem [shape: bf16[32,128], index: 1, kind: input, shape index: {}]   ;;  %s1193_s2 = inlined_call_operand.hbm [shape: f32[8,2,32], index: 2, kind: output, shape index: {}]  }
   0x1   :  { %v1015_v0 = vld [vmem:[%s1192_s1 + $0x8] sm:$0xff]   ;;  %829 = vmatprep.subr.bf16.mxu0 %v989_v1  ;;  %837 = vmatprep.subr.bf16.mxu1 %v989_v1  ;;  %v1023_v2 = vld [vmem:[%s1192_s1] sm:$0xff]  }
   0x2   :  { %830 = vmatpush3.bf16.msra.mxu0 %v1015_v0  ;;  %833 = vmatprep.mubr.msk.bf16.mxu0 %vm990_vm0, %v989_v1 }
   0x3   :  { %7 = vsyncpa [#allocation5], 0  ;;  %831 = vmatprep.subr.bf16.mxu0 %v989_v1  ;;  %18 = vst.msk [vmem:[#allocation2] sm:$0x3] %vm17_vm1, %v989_v1  ;;  %838 = vmatpush3.bf16.msra.mxu1 %v1015_v0  ;;  %vm41_vm2 = vcmask 261120   ;;  %s991_s14 = smov 64  }
   0x4   :  { %19 = vst.msk [vmem:[#allocation3] sm:$0x3] %vm17_vm1, %v989_v1  ;;  %839 = vmatprep.subr.bf16.mxu1 %v989_v1  ;;  %841 = vmatprep.mubr.msk.bf16.mxu1 %vm990_vm0, %v989_v1  ;;  %v26_v5 = vld [vmem:[%s1191_s0] sm:$0x1]  ;;  %s992_s15 = smov 32   ;;  %s995_s30 = smov [#allocation4]  }
   0x5   :  { %v27_v6 = vunpack.c.l.bf16 %v26_v5  ;;  %v784_v29 = vld [vmem:[%s1191_s0 + $0x1] sm:$0x1]  ;;  %v787_v51 = vld [vmem:[%s1191_s0 + $0x2] sm:$0x1]  ;;  %s768_s3 = sshll.u32 %s995_s30, 4  ;;  %s769_s3 = int_to_ptr.vmem [resolvable:$true] %s768_s3 }
   0x6   :  { %832 = vmatpush3.bf16.msra.mxu0 %v1023_v2  ;;  %v136_v30 = vunpack.c.l.bf16 %v784_v29  ;;  %v224_v52 = vunpack.c.l.bf16 %v787_v51  ;;  %s967_s4 = scalar_lea.vmem %s769_s3, 256  ;;  %p972_p1 = scmp.lt.s32.totalorder %s769_s3, %s769_s3 }
   0x7   :  { %840 = vmatpush3.bf16.msra.mxu1 %v1023_v2  ;;  %845 = vmatprep.subr.bf16.mxu0 %v989_v1  ;;  %p968_p0 = scmp.ne.s32.totalorder %s769_s3, %s967_s4  ;;  %p973_p2 = scmp.lt.s32.totalorder %s967_s4, %s967_s4 }
   0x8   :  { %853 = vmatprep.subr.bf16.mxu1 %v989_v1 }
   0x9   :  { %p974_p3 = por %p973_p2, %p972_p1 }
   0xa   :  { %v24_v3 = vld [vmem:[#allocation2] sm:$0x3] }
   0xb   :  { %v28_v4 = vpack.c.bf16 %v24_v3, %v24_v3  ;;  %v783_v13 = vld.sshfl [vmem:[#allocation3] sm:$0x3 pattern:$0x76325410]  ;;  %p975_p4 = pnand %p974_p3, %p968_p0 }
   0xd   :  { %834 = vmatmul.mubr.msk.bf16.vlgmr.msra.gmra.mxu0 %vm41_vm2, %v28_v4 }
   0xe   :  { %846 = vmatpush3.bf16.msra.mxu0 %v1015_v0  ;;  %849 = vmatprep.mubr.msk.bf16.mxu0 %vm990_vm0, %v989_v1 }
   0xf   :  { %847 = vmatprep.subr.bf16.mxu0 %v989_v1 }
  0x12   :  { %848 = vmatpush3.bf16.msra.mxu0 %v1023_v2 }
  0x13   :  { %861 = vmatprep.subr.bf16.mxu0 %v989_v1 }
  0xcd   :  { %v79_v7 = vpop.f32.mrf.mxu0 }
  0xce   :  { %v85_v8 = vadd.f32 %v79_v7, %v27_v6 }
  0xcf   :  { %v835_v9 = vpop.f32.mrf.mxu0 }
  0xd0   :  { %903 = vtanh.f32 %v85_v8  ;;  %v782_v14 = vmul.f32 -1.442695, %v85_v8 }
  0xd1   :  { %v82_v10 = vpop.f32.mrf.mxu0 }
  0xd2   :  { %905 = vpow2.f32 %v782_v14 }
  0xd3   :  { %v836_v11 = vpop.f32.mrf.mxu0 }
  0xdd   :  { %v904_v12 = vpop.eup %903 }
  0xde   :  { %106 = vrot.lane.b32.xlu0 %v904_v12, %s991_s14  ;;  %v790_v12 = vld [vmem:[%s1191_s0 + $0x3] sm:$0x1] }
  0xdf   :  { %v906_v15 = vpop.eup %905 }
  0xe0   :  { %v89_v16 = vadd.f32 1.0, %v906_v15 }
  0xe2   :  { %101 = vrot.lane.b32.xlu0 %v783_v13, %s992_s15  ;;  %907 = vrcp.f32 %v89_v16  ;;  %v312_v13 = vunpack.c.l.bf16 %v790_v12 }
  0xef   :  { %v908_v17 = vpop.eup %907 }
 0x150   :  { %v107_v18 = vpop.permute.xlu0 %106 }
 0x151   :  { %v109_v19 = vmul.f32 %v908_v17, %v107_v18 }
 0x153   :  { %111 = vrot.lane.b32.xlu1 %v109_v19, %s992_s15 }
 0x154   :  { %v102_v20 = vpop.permute.xlu0 %101 }
 0x155   :  { %v104_v21 = vmul.f32 %v908_v17, %v102_v20 }
 0x1c5   :  { %v112_v22 = vpop.permute.xlu1 %111 }
 0x1c6   :  { %v114_v23 = vadd.f32 %v112_v22, %v104_v21 }
 0x1c8   :  { %909 = vtanh.f32 %v114_v23 }
 0x1d5   :  { %v910_v24 = vpop.eup %909 }
 0x1d6   :  { %117 = vrot.lane.b32.xlu1 %v910_v24, %s991_s14 }
 0x248   :  { %v118_v25 = vpop.permute.xlu1 %117 }
 0x249   :  { %v1054_v26 = vmul.f32 %v908_v17, %v118_v25 }
 0x24b   :  { %v137_v27 = vpack.c.bf16 %v1054_v26, %v1054_v26 }
 0x24d   :  { %139 = vrot.lane.b32.xlu0 %v137_v27, %s992_s15 }
 0x2bf   :  { %v140_v28 = vpop.permute.xlu0 %139 }
 0x2c0   :  { %842 = vmatmul.mubr.msk.bf16.vlgmr.msra.gmra.mxu1 %vm41_vm2, %v140_v28 }
 0x2c1   :  { %854 = vmatpush3.bf16.msra.mxu1 %v1015_v0  ;;  %857 = vmatprep.mubr.msk.bf16.mxu1 %vm990_vm0, %v989_v1 }
 0x2c2   :  { %855 = vmatprep.subr.bf16.mxu1 %v989_v1 }
 0x2c5   :  { %856 = vmatpush3.bf16.msra.mxu1 %v1023_v2 }
 0x2c6   :  { %869 = vmatprep.subr.bf16.mxu1 %v989_v1 }
 0x380   :  { %v178_v31 = vpop.f32.mrf.mxu1 }
 0x381   :  { %v184_v32 = vadd.f32 %v178_v31, %v136_v30 }
 0x382   :  { %v843_v33 = vpop.f32.mrf.mxu1 }
 0x383   :  { %911 = vtanh.f32 %v184_v32  ;;  %v786_v37 = vmul.f32 -1.442695, %v184_v32 }
 0x384   :  { %v181_v34 = vpop.f32.mrf.mxu1 }
 0x385   :  { %913 = vpow2.f32 %v786_v37 }
 0x386   :  { %v844_v35 = vpop.f32.mrf.mxu1 }
 0x387   :  { %v793_v35 = vld [vmem:[%s1191_s0 + $0x4] sm:$0x1] }
 0x390   :  { %v912_v36 = vpop.eup %911 }
 0x391   :  { %194 = vrot.lane.b32.xlu1 %v912_v36, %s991_s14  ;;  %v400_v36 = vunpack.c.l.bf16 %v793_v35 }
 0x392   :  { %v914_v38 = vpop.eup %913 }
 0x393   :  { %v188_v39 = vadd.f32 1.0, %v914_v38 }
 0x395   :  { %915 = vrcp.f32 %v188_v39 }
 0x3a2   :  { %v916_v40 = vpop.eup %915 }
 0x3a3   :  { %v192_v43 = vmul.f32 %v916_v40, %v114_v23 }
 0x403   :  { %v195_v41 = vpop.permute.xlu1 %194 }
 0x404   :  { %v197_v42 = vmul.f32 %v916_v40, %v195_v41 }
 0x406   :  { %199 = vrot.lane.b32.xlu0 %v197_v42, %s992_s15 }
 0x478   :  { %v200_v44 = vpop.permute.xlu0 %199 }
 0x479   :  { %v202_v45 = vadd.f32 %v200_v44, %v192_v43 }
 0x47b   :  { %917 = vtanh.f32 %v202_v45 }
 0x488   :  { %v918_v46 = vpop.eup %917 }
 0x489   :  { %205 = vrot.lane.b32.xlu1 %v918_v46, %s991_s14 }
 0x4fb   :  { %v206_v47 = vpop.permute.xlu1 %205 }
 0x4fc   :  { %v1072_v48 = vmul.f32 %v916_v40, %v206_v47 }
 0x4fe   :  { %v225_v49 = vpack.c.bf16 %v1072_v48, %v1072_v48 }
 0x500   :  { %227 = vrot.lane.b32.xlu0 %v225_v49, %s992_s15 }
 0x572   :  { %v228_v50 = vpop.permute.xlu0 %227 }
 0x573   :  { %850 = vmatmul.mubr.msk.bf16.vlgmr.msra.gmra.mxu0 %vm41_vm2, %v228_v50 }
 0x574   :  { %862 = vmatpush3.bf16.msra.mxu0 %v1015_v0  ;;  %865 = vmatprep.mubr.msk.bf16.mxu0 %vm990_vm0, %v989_v1 }
 0x575   :  { %863 = vmatprep.subr.bf16.mxu0 %v989_v1 }
 0x578   :  { %864 = vmatpush3.bf16.msra.mxu0 %v1023_v2 }
 0x579   :  { %877 = vmatprep.subr.bf16.mxu0 %v989_v1 }
 0x633   :  { %v266_v53 = vpop.f32.mrf.mxu0 }
 0x634   :  { %v272_v54 = vadd.f32 %v266_v53, %v224_v52 }
 0x635   :  { %v851_v55 = vpop.f32.mrf.mxu0 }
 0x636   :  { %919 = vtanh.f32 %v272_v54  ;;  %v789_v59 = vmul.f32 -1.442695, %v272_v54 }
 0x637   :  { %v269_v56 = vpop.f32.mrf.mxu0 }
 0x638   :  { %921 = vpow2.f32 %v789_v59 }
 0x639   :  { %v852_v57 = vpop.f32.mrf.mxu0 }
 0x643   :  { %v920_v58 = vpop.eup %919 }
 0x644   :  { %282 = vrot.lane.b32.xlu1 %v920_v58, %s991_s14  ;;  %v796_v58 = vld [vmem:[%s1191_s0 + $0x5] sm:$0x1] }
 0x645   :  { %v922_v60 = vpop.eup %921  ;;  %v488_v59 = vunpack.c.l.bf16 %v796_v58 }
 0x646   :  { %v276_v61 = vadd.f32 1.0, %v922_v60 }
 0x648   :  { %923 = vrcp.f32 %v276_v61 }
 0x655   :  { %v924_v62 = vpop.eup %923 }
 0x656   :  { %v280_v4 = vmul.f32 %v924_v62, %v202_v45 }
 0x6b6   :  { %v283_v63 = vpop.permute.xlu1 %282 }
 0x6b7   :  { %v285_v3 = vmul.f32 %v924_v62, %v283_v63 }
 0x6b9   :  { %287 = vrot.lane.b32.xlu0 %v285_v3, %s992_s15 }
 0x72b   :  { %v288_v5 = vpop.permute.xlu0 %287 }
 0x72c   :  { %v290_v6 = vadd.f32 %v288_v5, %v280_v4 }
 0x72e   :  { %925 = vtanh.f32 %v290_v6 }
 0x73b   :  { %v926_v7 = vpop.eup %925 }
 0x73c   :  { %293 = vrot.lane.b32.xlu1 %v926_v7, %s991_s14 }
 0x7ae   :  { %v294_v8 = vpop.permute.xlu1 %293 }
 0x7af   :  { %v1090_v9 = vmul.f32 %v924_v62, %v294_v8 }
 0x7b1   :  { %v313_v10 = vpack.c.bf16 %v1090_v9, %v1090_v9 }
 0x7b3   :  { %315 = vrot.lane.b32.xlu0 %v313_v10, %s992_s15 }
 0x825   :  { %v316_v11 = vpop.permute.xlu0 %315 }
 0x826   :  { %858 = vmatmul.mubr.msk.bf16.vlgmr.msra.gmra.mxu1 %vm41_vm2, %v316_v11 }
 0x827   :  { %870 = vmatpush3.bf16.msra.mxu1 %v1015_v0  ;;  %873 = vmatprep.mubr.msk.bf16.mxu1 %vm990_vm0, %v989_v1 }
 0x828   :  { %871 = vmatprep.subr.bf16.mxu1 %v989_v1 }
 0x82b   :  { %872 = vmatpush3.bf16.msra.mxu1 %v1023_v2 }
 0x82c   :  { %885 = vmatprep.subr.bf16.mxu1 %v989_v1 }
 0x8e6   :  { %v354_v14 = vpop.f32.mrf.mxu1 }
 0x8e7   :  { %v360_v15 = vadd.f32 %v354_v14, %v312_v13 }
 0x8e8   :  { %v859_v16 = vpop.f32.mrf.mxu1 }
 0x8e9   :  { %927 = vtanh.f32 %v360_v15  ;;  %v792_v20 = vmul.f32 -1.442695, %v360_v15 }
 0x8ea   :  { %v357_v17 = vpop.f32.mrf.mxu1 }
 0x8eb   :  { %929 = vpow2.f32 %v792_v20  ;;  %v799_v17 = vld [vmem:[%s1191_s0 + $0x6] sm:$0x1] }
 0x8ec   :  { %v860_v18 = vpop.f32.mrf.mxu1 }
 0x8ed   :  { %v576_v18 = vunpack.c.l.bf16 %v799_v17 }
 0x8f6   :  { %v928_v19 = vpop.eup %927 }
 0x8f7   :  { %370 = vrot.lane.b32.xlu1 %v928_v19, %s991_s14 }
 0x8f8   :  { %v930_v21 = vpop.eup %929 }
 0x8f9   :  { %v364_v22 = vadd.f32 1.0, %v930_v21 }
 0x8fb   :  { %931 = vrcp.f32 %v364_v22 }
 0x908   :  { %v932_v23 = vpop.eup %931 }
 0x909   :  { %v368_v27 = vmul.f32 %v932_v23, %v290_v6 }
 0x969   :  { %v371_v24 = vpop.permute.xlu1 %370 }
 0x96a   :  { %v373_v25 = vmul.f32 %v932_v23, %v371_v24 }
 0x96c   :  { %375 = vrot.lane.b32.xlu0 %v373_v25, %s992_s15 }
 0x9de   :  { %v376_v28 = vpop.permute.xlu0 %375 }
 0x9df   :  { %v378_v29 = vadd.f32 %v376_v28, %v368_v27 }
 0x9e1   :  { %933 = vtanh.f32 %v378_v29 }
 0x9ee   :  { %v934_v30 = vpop.eup %933 }
 0x9ef   :  { %381 = vrot.lane.b32.xlu1 %v934_v30, %s991_s14 }
 0xa61   :  { %v382_v31 = vpop.permute.xlu1 %381 }
 0xa62   :  { %v1108_v32 = vmul.f32 %v932_v23, %v382_v31 }
 0xa64   :  { %v401_v33 = vpack.c.bf16 %v1108_v32, %v1108_v32 }
 0xa66   :  { %403 = vrot.lane.b32.xlu0 %v401_v33, %s992_s15 }
 0xad8   :  { %v404_v34 = vpop.permute.xlu0 %403 }
 0xad9   :  { %866 = vmatmul.mubr.msk.bf16.vlgmr.msra.gmra.mxu0 %vm41_vm2, %v404_v34 }
 0xada   :  { %878 = vmatpush3.bf16.msra.mxu0 %v1015_v0  ;;  %881 = vmatprep.mubr.msk.bf16.mxu0 %vm990_vm0, %v989_v1 }
 0xadb   :  { %879 = vmatprep.subr.bf16.mxu0 %v989_v1 }
 0xade   :  { %880 = vmatpush3.bf16.msra.mxu0 %v1023_v2 }
 0xb99   :  { %v442_v37 = vpop.f32.mrf.mxu0 }
 0xb9a   :  { %v448_v38 = vadd.f32 %v442_v37, %v400_v36 }
 0xb9b   :  { %v867_v39 = vpop.f32.mrf.mxu0 }
 0xb9c   :  { %935 = vtanh.f32 %v448_v38  ;;  %v795_v43 = vmul.f32 -1.442695, %v448_v38 }
 0xb9d   :  { %v445_v40 = vpop.f32.mrf.mxu0 }
 0xb9e   :  { %937 = vpow2.f32 %v795_v43 }
 0xb9f   :  { %v868_v41 = vpop.f32.mrf.mxu0 }
 0xba0   :  { %v802_v41 = vld [vmem:[%s1191_s0 + $0x7] sm:$0x1]  ;;  %s994_s0 = smov 96  }
 0xba9   :  { %v936_v42 = vpop.eup %935 }
 0xbaa   :  { %458 = vrot.lane.b32.xlu1 %v936_v42, %s991_s14  ;;  %v664_v42 = vunpack.c.l.bf16 %v802_v41 }
 0xbab   :  { %v938_v44 = vpop.eup %937 }
 0xbac   :  { %v452_v45 = vadd.f32 1.0, %v938_v44 }
 0xbae   :  { %939 = vrcp.f32 %v452_v45 }
 0xbbb   :  { %v940_v46 = vpop.eup %939 }
 0xbbc   :  { %v456_v50 = vmul.f32 %v940_v46, %v378_v29 }
 0xc1c   :  { %v459_v47 = vpop.permute.xlu1 %458 }
 0xc1d   :  { %v461_v49 = vmul.f32 %v940_v46, %v459_v47 }
 0xc1f   :  { %463 = vrot.lane.b32.xlu0 %v461_v49, %s992_s15 }
 0xc91   :  { %v464_v51 = vpop.permute.xlu0 %463 }
 0xc92   :  { %v466_v52 = vadd.f32 %v464_v51, %v456_v50 }
 0xc94   :  { %941 = vtanh.f32 %v466_v52 }
 0xca1   :  { %v942_v53 = vpop.eup %941 }
 0xca2   :  { %469 = vrot.lane.b32.xlu1 %v942_v53, %s991_s14  ;;  %v993_v53 = vmov 1983009808  }
 0xd14   :  { %v470_v54 = vpop.permute.xlu1 %469 }
 0xd15   :  { %v1125_v55 = vmul.f32 %v940_v46, %v470_v54  ;;  %v123_v54 = vunpack.c.l.s4 %v993_v53 }
 0xd17   :  { %v489_v56 = vpack.c.bf16 %v1125_v55, %v1125_v55 }
 0xd19   :  { %491 = vrot.lane.b32.xlu0 %v489_v56, %s992_s15  ;;  %v125_v56 = vlaneseq }
 0xd1b   :  { %v126_v58 = vshrl.u32 %v125_v56, 7 }
 0xd8b   :  { %v492_v57 = vpop.permute.xlu0 %491 }
 0xd8c   :  { %874 = vmatmul.mubr.msk.bf16.vlgmr.msra.gmra.mxu1 %vm41_vm2, %v492_v57  ;;  %v124_v57 = vunpack.c.0.s8 %v123_v54 }
 0xd8d   :  { %886 = vmatpush3.bf16.msra.mxu1 %v1015_v0  ;;  %889 = vmatprep.mubr.msk.bf16.mxu1 %vm990_vm0, %v989_v1 }
 0xd8e   :  { %887 = vmatprep.subr.bf16.mxu1 %v989_v1 }
 0xd91   :  { %888 = vmatpush3.bf16.msra.mxu1 %v1023_v2 }
 0xe4c   :  { %v530_v60 = vpop.f32.mrf.mxu1 }
 0xe4d   :  { %v536_v61 = vadd.f32 %v530_v60, %v488_v59 }
 0xe4e   :  { %v875_v62 = vpop.f32.mrf.mxu1 }
 0xe4f   :  { %943 = vtanh.f32 %v536_v61  ;;  %v798_v0 = vmul.f32 -1.442695, %v536_v61  ;;  %v127_v61 = vsub.s32 %v124_v57, %v126_v58 }
 0xe50   :  { %v533_v63 = vpop.f32.mrf.mxu1 }
 0xe51   :  { %945 = vpow2.f32 %v798_v0  ;;  %v128_v63 = vrot.slane %v1054_v26, %v127_v61 }
 0xe52   :  { %v876_v3 = vpop.f32.mrf.mxu1 }
 0xe53   :  { %v304_v3 = vrot.slane %v1090_v9, %v127_v61 }
 0xe5c   :  { %v944_v4 = vpop.eup %943 }
 0xe5d   :  { %546 = vrot.lane.b32.xlu1 %v944_v4, %s991_s14  ;;  %v480_v4 = vrot.slane %v1125_v55, %v127_v61 }
 0xe5e   :  { %v946_v5 = vpop.eup %945 }
 0xe5f   :  { %v540_v1 = vadd.f32 1.0, %v946_v5 }
 0xe61   :  { %947 = vrcp.f32 %v540_v1 }
 0xe6e   :  { %v948_v2 = vpop.eup %947 }
 0xe6f   :  { %v544_v8 = vmul.f32 %v948_v2, %v466_v52 }
 0xecf   :  { %v547_v6 = vpop.permute.xlu1 %546 }
 0xed0   :  { %v549_v7 = vmul.f32 %v948_v2, %v547_v6 }
 0xed2   :  { %551 = vrot.lane.b32.xlu0 %v549_v7, %s992_s15 }
 0xf44   :  { %v552_v10 = vpop.permute.xlu0 %551 }
 0xf45   :  { %v554_v11 = vadd.f32 %v552_v10, %v544_v8  ;;  %v216_v10 = vrot.slane %v1072_v48, %v127_v61 }
 0xf47   :  { %949 = vtanh.f32 %v554_v11 }
 0xf54   :  { %v950_v12 = vpop.eup %949 }
 0xf55   :  { %557 = vrot.lane.b32.xlu1 %v950_v12, %s991_s14 }
 0xfc7   :  { %v558_v13 = vpop.permute.xlu1 %557 }
 0xfc8   :  { %v1142_v14 = vmul.f32 %v948_v2, %v558_v13 }
 0xfca   :  { %v577_v15 = vpack.c.bf16 %v1142_v14, %v1142_v14  ;;  %v568_v12 = vrot.slane %v1142_v14, %v127_v61 }
 0xfcc   :  { %579 = vrot.lane.b32.xlu0 %v577_v15, %s992_s15 }
0x103e   :  { %v580_v16 = vpop.permute.xlu0 %579 }
0x103f   :  { %882 = vmatmul.mubr.msk.bf16.vlgmr.msra.gmra.mxu0 %vm41_vm2, %v580_v16 }
0x10ff   :  { %v618_v19 = vpop.f32.mrf.mxu0 }
0x1100   :  { %v624_v20 = vadd.f32 %v618_v19, %v576_v18 }
0x1101   :  { %v883_v21 = vpop.f32.mrf.mxu0 }
0x1102   :  { %951 = vtanh.f32 %v624_v20  ;;  %v801_v25 = vmul.f32 -1.442695, %v624_v20 }
0x1103   :  { %v621_v22 = vpop.f32.mrf.mxu0 }
0x1104   :  { %953 = vpow2.f32 %v801_v25 }
0x1105   :  { %v884_v23 = vpop.f32.mrf.mxu0 }
0x110f   :  { %v952_v24 = vpop.eup %951 }
0x1110   :  { %634 = vrot.lane.b32.xlu1 %v952_v24, %s991_s14 }
0x1111   :  { %v954_v27 = vpop.eup %953 }
0x1112   :  { %v628_v28 = vadd.f32 1.0, %v954_v27 }
0x1114   :  { %955 = vrcp.f32 %v628_v28 }
0x1121   :  { %v956_v29 = vpop.eup %955 }
0x1122   :  { %v632_v33 = vmul.f32 %v956_v29, %v554_v11  ;;  %v392_v11 = vrot.slane %v1108_v32, %v127_v61 }
0x1182   :  { %v635_v30 = vpop.permute.xlu1 %634 }
0x1183   :  { %v637_v31 = vmul.f32 %v956_v29, %v635_v30 }
0x1185   :  { %639 = vrot.lane.b32.xlu0 %v637_v31, %s992_s15 }
0x11f7   :  { %v640_v34 = vpop.permute.xlu0 %639 }
0x11f8   :  { %v642_v35 = vadd.f32 %v640_v34, %v632_v33 }
0x11fa   :  { %957 = vtanh.f32 %v642_v35 }
0x1207   :  { %v958_v36 = vpop.eup %957 }
0x1208   :  { %645 = vrot.lane.b32.xlu1 %v958_v36, %s991_s14 }
0x127a   :  { %v646_v37 = vpop.permute.xlu1 %645 }
0x127b   :  { %v648_v38 = vmul.f32 %v956_v29, %v646_v37 }
0x127d   :  { %v665_v39 = vpack.c.bf16 %v648_v38, %v648_v38  ;;  %v656_v0 = vrot.slane %v648_v38, %v127_v61 }
0x127f   :  { %667 = vrot.lane.b32.xlu0 %v665_v39, %s992_s15 }
0x12f1   :  { %v668_v40 = vpop.permute.xlu0 %667 }
0x12f2   :  { %890 = vmatmul.mubr.msk.bf16.vlgmr.msra.gmra.mxu1 %vm41_vm2, %v668_v40 }
0x13b2   :  { %v706_v43 = vpop.f32.mrf.mxu1 }
0x13b3   :  { %v712_v44 = vadd.f32 %v706_v43, %v664_v42 }
0x13b4   :  { %v891_v45 = vpop.f32.mrf.mxu1 }
0x13b5   :  { %959 = vtanh.f32 %v712_v44  ;;  %v804_v50 = vmul.f32 -1.442695, %v712_v44 }
0x13b6   :  { %v709_v46 = vpop.f32.mrf.mxu1 }
0x13b7   :  { %961 = vpow2.f32 %v804_v50 }
0x13b8   :  { %v892_v47 = vpop.f32.mrf.mxu1 }
0x13c2   :  { %v960_v49 = vpop.eup %959 }
0x13c3   :  { %722 = vrot.lane.b32.xlu1 %v960_v49, %s991_s14 }
0x13c4   :  { %v962_v51 = vpop.eup %961 }
0x13c5   :  { %v716_v52 = vadd.f32 1.0, %v962_v51 }
0x13c7   :  { %963 = vrcp.f32 %v716_v52 }
0x13d4   :  { %v964_v59 = vpop.eup %963 }
0x13d5   :  { %v720_v5 = vmul.f32 %v964_v59, %v642_v35 }
0x1435   :  { %v723_v60 = vpop.permute.xlu1 %722 }
0x1436   :  { %v725_v62 = vmul.f32 %v964_v59, %v723_v60 }
0x1438   :  { %727 = vrot.lane.b32.xlu0 %v725_v62, %s992_s15 }
0x143c   :  { %129 = vrot.lane.b32.xlu0 %v128_v63, %s992_s15 }
0x1440   :  { %305 = vrot.lane.b32.xlu0 %v304_v3, %s992_s15 }
0x1444   :  { %481 = vrot.lane.b32.xlu0 %v480_v4, %s992_s15 }
0x1448   :  { %657 = vrot.lane.b32.xlu0 %v656_v0, %s992_s15 }
0x14aa   :  { %v728_v1 = vpop.permute.xlu0 %727 }
0x14ab   :  { %v730_v2 = vadd.f32 %v728_v1, %v720_v5 }
0x14ad   :  { %965 = vtanh.f32 %v730_v2  ;;  %v758_v6 = vrot.slane %v730_v2, %v127_v61 }
0x14ae   :  { %v130_v7 = vpop.permute.xlu0 %129 }
0x14af   :  { %133 = vst.msk [vmem:[#allocation4] sm:$0x3] %vm17_vm1, %v130_v7  ;;  %759 = vrot.lane.b32.xlu0 %v758_v6, %s994_s0 }
0x14b2   :  { %v306_v26 = vpop.permute.xlu0 %305 }
0x14b3   :  { %309 = vst.msk [vmem:[#allocation4 + $0x4] sm:$0x3] %vm17_vm1, %v306_v26 }
0x14b6   :  { %v482_v9 = vpop.permute.xlu0 %481 }
0x14b7   :  { %485 = vst.msk [vmem:[#allocation4 + $0x8] sm:$0x3] %vm17_vm1, %v482_v9 }
0x14ba   :  { %v966_v55 = vpop.eup %965  ;;  %v658_v8 = vpop.permute.xlu0 %657 }
0x14bb   :  { %661 = vst.msk [vmem:[#allocation4 + $0xc] sm:$0x3] %vm17_vm1, %v658_v8  ;;  %733 = vrot.lane.b32.xlu1 %v966_v55, %s991_s14 }
0x14bf   :  { %217 = vrot.lane.b32.xlu1 %v216_v10, %s992_s15 }
0x14c3   :  { %393 = vrot.lane.b32.xlu1 %v392_v11, %s992_s15 }
0x14c7   :  { %569 = vrot.lane.b32.xlu1 %v568_v12, %s992_s15 }
0x1521   :  { %v760_v13 = vpop.permute.xlu0 %759 }
0x1522   :  { %762 = vst.msk [vmem:[#allocation3] sm:$0x3] %vm17_vm1, %v760_v13 }
0x152d   :  { %v734_v15 = vpop.permute.xlu1 %733 }
0x152e   :  { %v736_v16 = vmul.f32 %v964_v59, %v734_v15 }
0x1530   :  { %v744_v17 = vrot.slane %v736_v16, %v127_v61 }
0x1531   :  { %v218_v18 = vpop.permute.xlu1 %217 }
0x1532   :  { %221 = vst.msk [vmem:[#allocation4 + $0x2] sm:$0x3] %vm17_vm1, %v218_v18  ;;  %745 = vrot.lane.b32.xlu1 %v744_v17, %s992_s15 }
0x1535   :  { %v394_v48 = vpop.permute.xlu1 %393 }
0x1536   :  { %397 = vst.msk [vmem:[#allocation4 + $0x6] sm:$0x3] %vm17_vm1, %v394_v48 }
0x1539   :  { %v570_v32 = vpop.permute.xlu1 %569 }
0x153a   :  { %573 = vst.msk [vmem:[#allocation4 + $0xa] sm:$0x3] %vm17_vm1, %v570_v32 }
0x15a4   :  { %v746_v14 = vpop.permute.xlu1 %745 }
0x15a5   :  { %749 = vst.msk [vmem:[#allocation4 + $0xe] sm:$0x3] %vm17_vm1, %v746_v14  ;;  %750 = vst.msk [vmem:[#allocation2] sm:$0x3] %vm17_vm1, %v746_v14 }
0x15a6   :  { %978 = shalt.err (!%p975_p4)
}
0x15a7   :  { %s996_s5 = smov 2  }
0x15a8   :  { %774 = dma.vmem_to_hbm [thread:$0]  %s769_s3, 256, %s1193_s2, [#allocation5], %s992_s15, %s992_s15, %s996_s5  }
0x15a9   :  { %987 = dma.done.wait [#allocation5], 256  }
0x15aa   :  { %988 = vsyncadd [#allocation5], 4294967040 }
0x15ab   :  { %778 = vsyncpa [#allocation5], 1 }

</bundles_post_ra>
